<compile_context>
chip_gen: v5e
topology: v5e:2x2
jax: 0.10.0
libtpu: 0.0.40
codegen_flags: <defaults>
</compile_context>

<pallas_src>
import functools

import jax
import jax.numpy as jnp
from jax.experimental import pallas as pl
from jax.experimental.pallas import tpu as pltpu


# ----------------------------- fused Pallas kernel ------------------------- #

def _fused_model_kernel(x_ref, w0_ref, b0_ref, w1_ref, b1_ref,
                        w2_ref, b2_ref, w3_ref, b3_ref, o_ref,
                        *, B, OH, OW):
    """relu6 -> 1x1 -> relu6 -> 1x1 -> relu6 -> 3x3/s2/p1 -> relu6 -> 1x1
       -> relu6 -> (x2) -> 1x1 -> relu6, all resident in VMEM."""
    f32 = jnp.float32
    bf16 = jnp.bfloat16
    HW = 4 * OH * OW          # rows per image (compact, no padding rows)
    M1 = B * HW               # rows for the two 1x1 layers
    M2 = B * OH * OW          # rows for the post-stride layers

    # ---- v1 = relu6(x); v2 = conv2d(v1)  (1x1 conv == matmul) -------------
    x = x_ref[...].reshape(M1, x_ref.shape[-1]).astype(f32)
    a1 = jnp.clip(x, 0.0, 6.0).astype(bf16)
    h1 = jnp.dot(a1, w0_ref[...], preferred_element_type=f32) + b0_ref[...]

    # ---- v3 = relu6(v2); v4 = conv2d_1(v3) --------------------------------
    a2 = jnp.clip(h1, 0.0, 6.0).astype(bf16)
    h2 = jnp.dot(a2, w1_ref[...], preferred_element_type=f32) + b1_ref[...]

    # ---- v5 = relu6(v4); v7 = conv2d_2(v5)  [3x3, stride 2, pad 1] --------
    # Rows are packed (ph, pw, hc, wc) with pixel (h, w) = (2*hc+ph, 2*wc+pw).
    # Tap (ky, kx) of output (oh, ow) reads pixel (2*oh+ky-1, 2*ow+kx-1):
    #   ky=1 -> plane ph=0 row oh        kx=1 -> plane pw=0 col ow
    #   ky=2 -> plane ph=1 row oh        kx=2 -> plane pw=1 col ow
    #   ky=0 -> plane ph=1 row oh-1      kx=0 -> plane pw=1 col ow-1
    # (shifts with zero fill supply the conv's zero padding).
    a3 = jnp.clip(h2, 0.0, 6.0)                           # f32 (M1, 128)
    C3 = a3.shape[-1]
    a3 = a3.reshape(B, 4, OH, OW, C3)                     # (b, ph*2+pw, hc, wc, c)
    p00, p01, p10, p11 = a3[:, 0], a3[:, 1], a3[:, 2], a3[:, 3]

    zrow = jnp.zeros((B, 1, OW, C3), f32)
    zcol = jnp.zeros((B, OH, 1, C3), f32)

    def hshift(p):   # row oh reads row oh-1; row 0 sees the zero padding row
        return jnp.concatenate([zrow, p[:, :OH - 1]], axis=1)

    def wshift(p):   # col ow reads col ow-1; col 0 sees the zero padding col
        return jnp.concatenate([zcol, p[:, :, :OW - 1]], axis=2)

    wp01 = wshift(p01)
    wp11 = wshift(p11)
    taps = (
        hshift(wp11),   # (ky, kx) = (0, 0)
        hshift(p10),    # (0, 1)
        hshift(p11),    # (0, 2)
        wp01,           # (1, 0)
        p00,            # (1, 1)
        p01,            # (1, 2)
        wp11,           # (2, 0)
        p10,            # (2, 1)
        p11,            # (2, 2)
    )
    # im2col LHS built once in VMEM -> one wide-K matmul (K = 9 * 128).
    lhs = jnp.concatenate(
        [t.reshape(M2, C3).astype(bf16) for t in taps], axis=-1)
    h3 = jnp.dot(lhs, w2_ref[...], preferred_element_type=f32) + b2_ref[...]

    # ---- v8 = relu6(v7); v9 = conv2d_3(v8) --------------------------------
    a4 = jnp.clip(h3, 0.0, 6.0).astype(bf16)
    h4 = jnp.dot(a4, w3_ref[...], preferred_element_type=f32) + b3_ref[...]

    # ---- v10 = relu6(v9); v11 = v10 + v10; v12 = conv2d_1(v11) ------------
    a5 = (2.0 * jnp.clip(h4, 0.0, 6.0)).astype(bf16)
    h5 = jnp.dot(a5, w1_ref[...], preferred_element_type=f32) + b1_ref[...]

    # ---- v13 = relu6(v12) --------------------------------------------------
    out = jnp.clip(h5, 0.0, 6.0)
    o_ref[...] = out.reshape(B, OH * OW, out.shape[-1]).astype(o_ref.dtype)


# ------------------------------- wrapper glue ------------------------------ #

def _pick_b_tile(n):
    """Largest batch tile <= 8 that divides n while keeping >= 2 grid steps
    (so v7x's two TensorCores both get work under dimension_semantics
    ("parallel",)); falls back to 1."""
    for bt in (8, 4, 2):
        if n % bt == 0 and n // bt >= 2:
            return bt
    return 1


def init_params(key):
    """Deterministic PyTorch-style (uniform +-1/sqrt(fan_in)) conv params."""
    def conv_params(k, cout, cin, kh, kw):
        k1, k2 = jax.random.split(k)
        bound = 1.0 / float(cin * kh * kw) ** 0.5
        w = jax.random.uniform(k1, (cout, cin, kh, kw), jnp.float32, -bound, bound)
        b = jax.random.uniform(k2, (cout,), jnp.float32, -bound, bound)
        return w, b

    k0, k1, k2, k3 = jax.random.split(key, 4)
    return {
        "conv2d":   conv_params(k0, 256, 64, 1, 1),
        "conv2d_1": conv_params(k1, 128, 256, 1, 1),   # see TODO(synk) above
        "conv2d_2": conv_params(k2, 128, 128, 3, 3),
        "conv2d_3": conv_params(k3, 256, 128, 1, 1),
    }


@jax.jit
def model_forward(x_nchw, params):
    w0, b0 = params["conv2d"]      # (256, 64, 1, 1)
    w1, b1 = params["conv2d_1"]    # (128, 256, 1, 1)
    w2, b2 = params["conv2d_2"]    # (128, 128, 3, 3)
    w3, b3 = params["conv2d_3"]    # (256, 128, 1, 1)

    N, C, H, W = x_nchw.shape
    assert H % 2 == 0 and W % 2 == 0 and (W // 2) % 8 == 0, (H, W)
    OH, OW = H // 2, W // 2
    HW = H * W
    COUT = w1.shape[0]             # final channel count (128)
    B_TILE = _pick_b_tile(N)

    # --- compact bf16 phase packing: (b, h%2, w%2, h//2, w//2, c) rows ------
    # (1x1 convs are row-order agnostic; this order makes every 3x3 tap a
    # tile-aligned slice inside the kernel.  No pad rows, no K pad, bf16.)
    xt = jnp.transpose(x_nchw, (0, 2, 3, 1))              # NHWC
    xt = xt.reshape(N, OH, 2, OW, 2, C)                   # (n, hc, ph, wc, pw, c)
    xt = jnp.transpose(xt, (0, 2, 4, 1, 3, 5))            # (n, ph, pw, hc, wc, c)
    x_packed = xt.reshape(N, HW, C).astype(jnp.bfloat16)  # (N, 256, 64)

    # weights as (K, N) matmul operands, bf16 for the MXU fast path
    w0_mat = w0[:, :, 0, 0].T.astype(jnp.bfloat16)                 # (64, 256)
    w1_mat = w1[:, :, 0, 0].T.astype(jnp.bfloat16)                 # (256, 128)
    w2_mat = jnp.transpose(w2, (2, 3, 1, 0)).reshape(
        9 * w2.shape[1], w2.shape[0]).astype(jnp.bfloat16)         # (1152, 128)
    w3_mat = w3[:, :, 0, 0].T.astype(jnp.bfloat16)                 # (128, 256)
    b0r, b1r, b2r, b3r = (b.reshape(1, -1) for b in (b0, b1, b2, b3))

    kernel = functools.partial(_fused_model_kernel, B=B_TILE, OH=OH, OW=OW)

    out = pl.pallas_call(
        kernel,
        out_shape=jax.ShapeDtypeStruct((N, OH * OW, COUT), jnp.float32),
        grid=(N // B_TILE,),
        in_specs=[
            pl.BlockSpec((B_TILE, HW, C), lambda i: (i, 0, 0)),    # image rows
            pl.BlockSpec(w0_mat.shape, lambda i: (0, 0)),          # weights/biases:
            pl.BlockSpec(b0r.shape, lambda i: (0, 0)),             # constant index
            pl.BlockSpec(w1_mat.shape, lambda i: (0, 0)),          # -> fetched once,
            pl.BlockSpec(b1r.shape, lambda i: (0, 0)),             # stay resident
            pl.BlockSpec(w2_mat.shape, lambda i: (0, 0)),
            pl.BlockSpec(b2r.shape, lambda i: (0, 0)),
            pl.BlockSpec(w3_mat.shape, lambda i: (0, 0)),
            pl.BlockSpec(b3r.shape, lambda i: (0, 0)),
        ],
        out_specs=pl.BlockSpec((B_TILE, OH * OW, COUT), lambda i: (i, 0, 0)),
        compiler_params=pltpu.CompilerParams(
            dimension_semantics=("parallel",)),
    )(x_packed, w0_mat, b0r, w1_mat, b1r, w2_mat, b2r, w3_mat, b3r)

    out = out.reshape(N, OH, OW, COUT)
    return jnp.transpose(out, (0, 3, 1, 2))                        # NCHW


# ---------------------- pure-JAX reference (for check) --------------------- #

def reference_forward(x, params):
    def relu6(v):
        return jnp.clip(v, 0.0, 6.0)

    def conv(v, w, b, stride=1, pad=0):
        out = jax.lax.conv_general_dilated(
            v, w, (stride, stride), [(pad, pad), (pad, pad)],
            dimension_numbers=("NCHW", "OIHW", "NCHW"),
            precision=jax.lax.Precision.HIGHEST)
        return out + b.reshape(1, -1, 1, 1)

    w0, b0 = params["conv2d"]
    w1, b1 = params["conv2d_1"]
    w2, b2 = params["conv2d_2"]
    w3, b3 = params["conv2d_3"]
    v1 = relu6(x)
    v2 = conv(v1, w0, b0)
    v3 = relu6(v2)
    v4 = conv(v3, w1, b1)
    v5 = relu6(v4)
    v7 = conv(v5, w2, b2, stride=2, pad=1)
    v8 = relu6(v7)
    v9 = conv(v8, w3, b3)
    v10 = relu6(v9)
    v11 = v10 + v10
    v12 = conv(v11, w1, b1)
    return relu6(v12)


if __name__ == "__main__":
    key = jax.random.PRNGKey(0)
    kx, kp = jax.random.split(key)
    x = jax.random.normal(kx, (2, 64, 16, 16), jnp.float32)   # small NCHW input
    params = init_params(kp)

    out = jax.block_until_ready(model_forward(x, params))

    ref = reference_forward(x, params)
    assert out.shape == ref.shape == (2, 128, 8, 8), (out.shape, ref.shape)
    max_err = float(jnp.max(jnp.abs(out - ref)))
    # bf16 MXU operands (f32 accumulate) across a 5-matmul chain vs an f32
    # HIGHEST-precision reference: expected error is O(1e-3..1e-2) on O(1)
    # activations, so 5e-2 is a safe but still meaningful bound.
    if max_err > 5e-2:
        raise AssertionError(f"Pallas/reference mismatch: max abs err = {max_err}")
    print("KERNEL_OK")
</pallas_src>

<mosaic_0001>
module attributes {stable_mosaic.version = 11 : i64} {
  func.func @_fused_model_kernel(%arg0: i32, %arg1: memref<1x256x64xbf16, #tpu.memory_space<vmem>>, %arg2: memref<64x256xbf16, #tpu.memory_space<vmem>>, %arg3: memref<1x256xf32, #tpu.memory_space<vmem>>, %arg4: memref<256x128xbf16, #tpu.memory_space<vmem>>, %arg5: memref<1x128xf32, #tpu.memory_space<vmem>>, %arg6: memref<1152x128xbf16, #tpu.memory_space<vmem>>, %arg7: memref<1x128xf32, #tpu.memory_space<vmem>>, %arg8: memref<128x256xbf16, #tpu.memory_space<vmem>>, %arg9: memref<1x256xf32, #tpu.memory_space<vmem>>, %arg10: memref<1x64x128xf32, #tpu.memory_space<vmem>>) attributes {dimension_semantics = [#tpu.dimension_semantics<parallel>], iteration_bounds = array<i64: 2>, scalar_prefetch = 0 : i64, scratch_operands = 0 : i64, tpu.core_type = #tpu.core_type<tc>, window_params = [{transform_indices = @transform_0, window_bounds = array<i64: 1, 256, 64>}, {pipeline_mode = #tpu.pipeline_mode<synchronous>, transform_indices = @transform_1, window_bounds = array<i64: 64, 256>}, {pipeline_mode = #tpu.pipeline_mode<synchronous>, transform_indices = @transform_2, window_bounds = array<i64: 1, 256>}, {pipeline_mode = #tpu.pipeline_mode<synchronous>, transform_indices = @transform_3, window_bounds = array<i64: 256, 128>}, {pipeline_mode = #tpu.pipeline_mode<synchronous>, transform_indices = @transform_4, window_bounds = array<i64: 1, 128>}, {pipeline_mode = #tpu.pipeline_mode<synchronous>, transform_indices = @transform_5, window_bounds = array<i64: 1152, 128>}, {pipeline_mode = #tpu.pipeline_mode<synchronous>, transform_indices = @transform_6, window_bounds = array<i64: 1, 128>}, {pipeline_mode = #tpu.pipeline_mode<synchronous>, transform_indices = @transform_7, window_bounds = array<i64: 128, 256>}, {pipeline_mode = #tpu.pipeline_mode<synchronous>, transform_indices = @transform_8, window_bounds = array<i64: 1, 256>}, {transform_indices = @transform_9, window_bounds = array<i64: 1, 64, 128>}]} {
    %c0 = arith.constant 0 : index
    %c0_0 = arith.constant 0 : index
    %c0_1 = arith.constant 0 : index
    %0 = vector.load %arg1[%c0, %c0_0, %c0_1] : memref<1x256x64xbf16, #tpu.memory_space<vmem>>, vector<1x256x64xbf16>
    %1 = vector.shape_cast %0 : vector<1x256x64xbf16> to vector<256x64xbf16>
    %2 = arith.extf %1 : vector<256x64xbf16> to vector<256x64xf32>
    %cst = arith.constant 0.000000e+00 : f32
    %cst_2 = arith.constant 6.000000e+00 : f32
    %3 = vector.broadcast %cst : f32 to vector<256x64xf32>
    %4 = arith.maximumf %3, %2 : vector<256x64xf32>
    %5 = vector.broadcast %cst_2 : f32 to vector<256x64xf32>
    %6 = arith.minimumf %5, %4 : vector<256x64xf32>
    %7 = arith.truncf %6 : vector<256x64xf32> to vector<256x64xbf16>
    %c0_3 = arith.constant 0 : index
    %c0_4 = arith.constant 0 : index
    %8 = vector.load %arg2[%c0_3, %c0_4] : memref<64x256xbf16, #tpu.memory_space<vmem>>, vector<64x256xbf16>
    %cst_5 = arith.constant dense<0.000000e+00> : vector<256x256xf32>
    %9 = tpu.matmul %7, %8, %cst_5 {dimension_numbers = #tpu.dot_dimension_numbers<[1], [0], [0], [1], [0, 0, 1, 1], [], []>} : vector<256x64xbf16>, vector<64x256xbf16>, vector<256x256xf32> -> vector<256x256xf32>
    %c0_6 = arith.constant 0 : index
    %c0_7 = arith.constant 0 : index
    %10 = vector.load %arg3[%c0_6, %c0_7] : memref<1x256xf32, #tpu.memory_space<vmem>>, vector<1x256xf32>
    %11 = vector.broadcast %10 : vector<1x256xf32> to vector<256x256xf32>
    %12 = arith.addf %9, %11 : vector<256x256xf32>
    %cst_8 = arith.constant 0.000000e+00 : f32
    %cst_9 = arith.constant 6.000000e+00 : f32
    %13 = vector.broadcast %cst_8 : f32 to vector<256x256xf32>
    %14 = arith.maximumf %13, %12 : vector<256x256xf32>
    %15 = vector.broadcast %cst_9 : f32 to vector<256x256xf32>
    %16 = arith.minimumf %15, %14 : vector<256x256xf32>
    %17 = arith.truncf %16 : vector<256x256xf32> to vector<256x256xbf16>
    %c0_10 = arith.constant 0 : index
    %c0_11 = arith.constant 0 : index
    %18 = vector.load %arg4[%c0_10, %c0_11] : memref<256x128xbf16, #tpu.memory_space<vmem>>, vector<256x128xbf16>
    %cst_12 = arith.constant dense<0.000000e+00> : vector<256x128xf32>
    %19 = tpu.matmul %17, %18, %cst_12 {dimension_numbers = #tpu.dot_dimension_numbers<[1], [0], [0], [1], [0, 0, 1, 1], [], []>} : vector<256x256xbf16>, vector<256x128xbf16>, vector<256x128xf32> -> vector<256x128xf32>
    %c0_13 = arith.constant 0 : index
    %c0_14 = arith.constant 0 : index
    %20 = vector.load %arg5[%c0_13, %c0_14] : memref<1x128xf32, #tpu.memory_space<vmem>>, vector<1x128xf32>
    %21 = vector.broadcast %20 : vector<1x128xf32> to vector<256x128xf32>
    %22 = arith.addf %19, %21 : vector<256x128xf32>
    %cst_15 = arith.constant 0.000000e+00 : f32
    %cst_16 = arith.constant 6.000000e+00 : f32
    %23 = vector.broadcast %cst_15 : f32 to vector<256x128xf32>
    %24 = arith.maximumf %23, %22 : vector<256x128xf32>
    %25 = vector.broadcast %cst_16 : f32 to vector<256x128xf32>
    %26 = arith.minimumf %25, %24 : vector<256x128xf32>
    %27 = vector.shape_cast %26 : vector<256x128xf32> to vector<1x4x8x8x128xf32>
    %28 = vector.extract_strided_slice %27 {offsets = [0, 0, 0, 0, 0], sizes = [1, 1, 8, 8, 128], strides = [1, 1, 1, 1, 1]} : vector<1x4x8x8x128xf32> to vector<1x1x8x8x128xf32>
    %29 = vector.shape_cast %28 : vector<1x1x8x8x128xf32> to vector<1x8x8x128xf32>
    %30 = vector.extract_strided_slice %27 {offsets = [0, 1, 0, 0, 0], sizes = [1, 1, 8, 8, 128], strides = [1, 1, 1, 1, 1]} : vector<1x4x8x8x128xf32> to vector<1x1x8x8x128xf32>
    %31 = vector.shape_cast %30 : vector<1x1x8x8x128xf32> to vector<1x8x8x128xf32>
    %32 = vector.extract_strided_slice %27 {offsets = [0, 2, 0, 0, 0], sizes = [1, 1, 8, 8, 128], strides = [1, 1, 1, 1, 1]} : vector<1x4x8x8x128xf32> to vector<1x1x8x8x128xf32>
    %33 = vector.shape_cast %32 : vector<1x1x8x8x128xf32> to vector<1x8x8x128xf32>
    %34 = vector.extract_strided_slice %27 {offsets = [0, 3, 0, 0, 0], sizes = [1, 1, 8, 8, 128], strides = [1, 1, 1, 1, 1]} : vector<1x4x8x8x128xf32> to vector<1x1x8x8x128xf32>
    %35 = vector.shape_cast %34 : vector<1x1x8x8x128xf32> to vector<1x8x8x128xf32>
    %cst_17 = arith.constant 0.000000e+00 : f32
    %36 = vector.broadcast %cst_17 : f32 to vector<1x1x8x128xf32>
    %cst_18 = arith.constant 0.000000e+00 : f32
    %37 = vector.broadcast %cst_18 : f32 to vector<1x8x1x128xf32>
    %38 = vector.extract_strided_slice %31 {offsets = [0, 0, 0, 0], sizes = [1, 8, 7, 128], strides = [1, 1, 1, 1]} : vector<1x8x8x128xf32> to vector<1x8x7x128xf32>
    %39 = tpu.concatenate %37, %38 in 2 : vector<1x8x1x128xf32>, vector<1x8x7x128xf32> -> vector<1x8x8x128xf32>
    %40 = vector.extract_strided_slice %35 {offsets = [0, 0, 0, 0], sizes = [1, 8, 7, 128], strides = [1, 1, 1, 1]} : vector<1x8x8x128xf32> to vector<1x8x7x128xf32>
    %41 = tpu.concatenate %37, %40 in 2 : vector<1x8x1x128xf32>, vector<1x8x7x128xf32> -> vector<1x8x8x128xf32>
    %42 = vector.extract_strided_slice %41 {offsets = [0, 0, 0, 0], sizes = [1, 7, 8, 128], strides = [1, 1, 1, 1]} : vector<1x8x8x128xf32> to vector<1x7x8x128xf32>
    %43 = tpu.concatenate %36, %42 in 1 : vector<1x1x8x128xf32>, vector<1x7x8x128xf32> -> vector<1x8x8x128xf32>
    %44 = vector.extract_strided_slice %33 {offsets = [0, 0, 0, 0], sizes = [1, 7, 8, 128], strides = [1, 1, 1, 1]} : vector<1x8x8x128xf32> to vector<1x7x8x128xf32>
    %45 = tpu.concatenate %36, %44 in 1 : vector<1x1x8x128xf32>, vector<1x7x8x128xf32> -> vector<1x8x8x128xf32>
    %46 = vector.extract_strided_slice %35 {offsets = [0, 0, 0, 0], sizes = [1, 7, 8, 128], strides = [1, 1, 1, 1]} : vector<1x8x8x128xf32> to vector<1x7x8x128xf32>
    %47 = tpu.concatenate %36, %46 in 1 : vector<1x1x8x128xf32>, vector<1x7x8x128xf32> -> vector<1x8x8x128xf32>
    %48 = vector.shape_cast %43 : vector<1x8x8x128xf32> to vector<64x128xf32>
    %49 = arith.truncf %48 : vector<64x128xf32> to vector<64x128xbf16>
    %50 = vector.shape_cast %45 : vector<1x8x8x128xf32> to vector<64x128xf32>
    %51 = arith.truncf %50 : vector<64x128xf32> to vector<64x128xbf16>
    %52 = vector.shape_cast %47 : vector<1x8x8x128xf32> to vector<64x128xf32>
    %53 = arith.truncf %52 : vector<64x128xf32> to vector<64x128xbf16>
    %54 = vector.shape_cast %39 : vector<1x8x8x128xf32> to vector<64x128xf32>
    %55 = arith.truncf %54 : vector<64x128xf32> to vector<64x128xbf16>
    %56 = vector.shape_cast %29 : vector<1x8x8x128xf32> to vector<64x128xf32>
    %57 = arith.truncf %56 : vector<64x128xf32> to vector<64x128xbf16>
    %58 = vector.shape_cast %31 : vector<1x8x8x128xf32> to vector<64x128xf32>
    %59 = arith.truncf %58 : vector<64x128xf32> to vector<64x128xbf16>
    %60 = vector.shape_cast %41 : vector<1x8x8x128xf32> to vector<64x128xf32>
    %61 = arith.truncf %60 : vector<64x128xf32> to vector<64x128xbf16>
    %62 = vector.shape_cast %33 : vector<1x8x8x128xf32> to vector<64x128xf32>
    %63 = arith.truncf %62 : vector<64x128xf32> to vector<64x128xbf16>
    %64 = vector.shape_cast %35 : vector<1x8x8x128xf32> to vector<64x128xf32>
    %65 = arith.truncf %64 : vector<64x128xf32> to vector<64x128xbf16>
    %66 = tpu.concatenate %49, %51, %53, %55, %57, %59, %61, %63, %65 in 1 : vector<64x128xbf16>, vector<64x128xbf16>, vector<64x128xbf16>, vector<64x128xbf16>, vector<64x128xbf16>, vector<64x128xbf16>, vector<64x128xbf16>, vector<64x128xbf16>, vector<64x128xbf16> -> vector<64x1152xbf16>
    %c0_19 = arith.constant 0 : index
    %c0_20 = arith.constant 0 : index
    %67 = vector.load %arg6[%c0_19, %c0_20] : memref<1152x128xbf16, #tpu.memory_space<vmem>>, vector<1152x128xbf16>
    %cst_21 = arith.constant dense<0.000000e+00> : vector<64x128xf32>
    %68 = tpu.matmul %66, %67, %cst_21 {dimension_numbers = #tpu.dot_dimension_numbers<[1], [0], [0], [1], [0, 0, 1, 1], [], []>} : vector<64x1152xbf16>, vector<1152x128xbf16>, vector<64x128xf32> -> vector<64x128xf32>
    %c0_22 = arith.constant 0 : index
    %c0_23 = arith.constant 0 : index
    %69 = vector.load %arg7[%c0_22, %c0_23] : memref<1x128xf32, #tpu.memory_space<vmem>>, vector<1x128xf32>
    %70 = vector.broadcast %69 : vector<1x128xf32> to vector<64x128xf32>
    %71 = arith.addf %68, %70 : vector<64x128xf32>
    %cst_24 = arith.constant 0.000000e+00 : f32
    %cst_25 = arith.constant 6.000000e+00 : f32
    %72 = vector.broadcast %cst_24 : f32 to vector<64x128xf32>
    %73 = arith.maximumf %72, %71 : vector<64x128xf32>
    %74 = vector.broadcast %cst_25 : f32 to vector<64x128xf32>
    %75 = arith.minimumf %74, %73 : vector<64x128xf32>
    %76 = arith.truncf %75 : vector<64x128xf32> to vector<64x128xbf16>
    %c0_26 = arith.constant 0 : index
    %c0_27 = arith.constant 0 : index
    %77 = vector.load %arg8[%c0_26, %c0_27] : memref<128x256xbf16, #tpu.memory_space<vmem>>, vector<128x256xbf16>
    %cst_28 = arith.constant dense<0.000000e+00> : vector<64x256xf32>
    %78 = tpu.matmul %76, %77, %cst_28 {dimension_numbers = #tpu.dot_dimension_numbers<[1], [0], [0], [1], [0, 0, 1, 1], [], []>} : vector<64x128xbf16>, vector<128x256xbf16>, vector<64x256xf32> -> vector<64x256xf32>
    %c0_29 = arith.constant 0 : index
    %c0_30 = arith.constant 0 : index
    %79 = vector.load %arg9[%c0_29, %c0_30] : memref<1x256xf32, #tpu.memory_space<vmem>>, vector<1x256xf32>
    %80 = vector.broadcast %79 : vector<1x256xf32> to vector<64x256xf32>
    %81 = arith.addf %78, %80 : vector<64x256xf32>
    %cst_31 = arith.constant 0.000000e+00 : f32
    %cst_32 = arith.constant 6.000000e+00 : f32
    %82 = vector.broadcast %cst_31 : f32 to vector<64x256xf32>
    %83 = arith.maximumf %82, %81 : vector<64x256xf32>
    %84 = vector.broadcast %cst_32 : f32 to vector<64x256xf32>
    %85 = arith.minimumf %84, %83 : vector<64x256xf32>
    %cst_33 = arith.constant 2.000000e+00 : f32
    %86 = vector.broadcast %cst_33 : f32 to vector<64x256xf32>
    %87 = arith.mulf %86, %85 : vector<64x256xf32>
    %88 = arith.truncf %87 : vector<64x256xf32> to vector<64x256xbf16>
    %c0_34 = arith.constant 0 : index
    %c0_35 = arith.constant 0 : index
    %89 = vector.load %arg4[%c0_34, %c0_35] : memref<256x128xbf16, #tpu.memory_space<vmem>>, vector<256x128xbf16>
    %cst_36 = arith.constant dense<0.000000e+00> : vector<64x128xf32>
    %90 = tpu.matmul %88, %89, %cst_36 {dimension_numbers = #tpu.dot_dimension_numbers<[1], [0], [0], [1], [0, 0, 1, 1], [], []>} : vector<64x256xbf16>, vector<256x128xbf16>, vector<64x128xf32> -> vector<64x128xf32>
    %c0_37 = arith.constant 0 : index
    %c0_38 = arith.constant 0 : index
    %91 = vector.load %arg5[%c0_37, %c0_38] : memref<1x128xf32, #tpu.memory_space<vmem>>, vector<1x128xf32>
    %92 = vector.broadcast %91 : vector<1x128xf32> to vector<64x128xf32>
    %93 = arith.addf %90, %92 : vector<64x128xf32>
    %cst_39 = arith.constant 0.000000e+00 : f32
    %cst_40 = arith.constant 6.000000e+00 : f32
    %94 = vector.broadcast %cst_39 : f32 to vector<64x128xf32>
    %95 = arith.maximumf %94, %93 : vector<64x128xf32>
    %96 = vector.broadcast %cst_40 : f32 to vector<64x128xf32>
    %97 = arith.minimumf %96, %95 : vector<64x128xf32>
    %98 = vector.shape_cast %97 : vector<64x128xf32> to vector<1x64x128xf32>
    %c0_41 = arith.constant 0 : index
    %c0_42 = arith.constant 0 : index
    %c0_43 = arith.constant 0 : index
    %99 = vector.load %arg10[%c0_41, %c0_42, %c0_43] : memref<1x64x128xf32, #tpu.memory_space<vmem>>, vector<1x64x128xf32>
    tpu.vector_store %arg10[%c0_41, %c0_42, %c0_43], %98 {strides = array<i32>} : memref<1x64x128xf32, #tpu.memory_space<vmem>>, vector<1x64x128xf32>,
    return
  }
  func.func @transform_0(%arg0: i32) -> (i32, i32, i32) {
    %c0_i32 = arith.constant 0 : i32
    %c0_i32_0 = arith.constant 0 : i32
    %c0_i32_1 = arith.constant 0 : i32
    return %arg0, %c0_i32, %c0_i32_0 : i32, i32, i32
  }
  func.func @transform_1(%arg0: i32) -> (i32, i32) {
    %c0_i32 = arith.constant 0 : i32
    %c0_i32_0 = arith.constant 0 : i32
    %c0_i32_1 = arith.constant 0 : i32
    return %c0_i32, %c0_i32_0 : i32, i32
  }
  func.func @transform_2(%arg0: i32) -> (i32, i32) {
    %c0_i32 = arith.constant 0 : i32
    %c0_i32_0 = arith.constant 0 : i32
    %c0_i32_1 = arith.constant 0 : i32
    return %c0_i32, %c0_i32_0 : i32, i32
  }
  func.func @transform_3(%arg0: i32) -> (i32, i32) {
    %c0_i32 = arith.constant 0 : i32
    %c0_i32_0 = arith.constant 0 : i32
    %c0_i32_1 = arith.constant 0 : i32
    return %c0_i32, %c0_i32_0 : i32, i32
  }
  func.func @transform_4(%arg0: i32) -> (i32, i32) {
    %c0_i32 = arith.constant 0 : i32
    %c0_i32_0 = arith.constant 0 : i32
    %c0_i32_1 = arith.constant 0 : i32
    return %c0_i32, %c0_i32_0 : i32, i32
  }
  func.func @transform_5(%arg0: i32) -> (i32, i32) {
    %c0_i32 = arith.constant 0 : i32
    %c0_i32_0 = arith.constant 0 : i32
    %c0_i32_1 = arith.constant 0 : i32
    return %c0_i32, %c0_i32_0 : i32, i32
  }
  func.func @transform_6(%arg0: i32) -> (i32, i32) {
    %c0_i32 = arith.constant 0 : i32
    %c0_i32_0 = arith.constant 0 : i32
    %c0_i32_1 = arith.constant 0 : i32
    return %c0_i32, %c0_i32_0 : i32, i32
  }
  func.func @transform_7(%arg0: i32) -> (i32, i32) {
    %c0_i32 = arith.constant 0 : i32
    %c0_i32_0 = arith.constant 0 : i32
    %c0_i32_1 = arith.constant 0 : i32
    return %c0_i32, %c0_i32_0 : i32, i32
  }
  func.func @transform_8(%arg0: i32) -> (i32, i32) {
    %c0_i32 = arith.constant 0 : i32
    %c0_i32_0 = arith.constant 0 : i32
    %c0_i32_1 = arith.constant 0 : i32
    return %c0_i32, %c0_i32_0 : i32, i32
  }
  func.func @transform_9(%arg0: i32) -> (i32, i32, i32) {
    %c0_i32 = arith.constant 0 : i32
    %c0_i32_0 = arith.constant 0 : i32
    %c0_i32_1 = arith.constant 0 : i32
    return %arg0, %c0_i32, %c0_i32_0 : i32, i32, i32
  }
}

</mosaic_0001>

<bundles_post_ra>
// kernel: model_forward.1
= control target key start
LH: loop header
LB: loop body
LE: loop exit
PB: predicated region body
PF: predicated region fallthrough
CT: control target
= control target key end

     0   :  { %14 = vsyncpa [#allocation3], 0  ;;  %s4859_s0 = inlined_call_operand.vmem [shape: bf16[2,256,64], index: 0, kind: input, shape index: {}]   ;;  %s4860_s1 = inlined_call_operand.vmem [shape: bf16[64,256], index: 1, kind: input, shape index: {}]   ;;  %s4861_s2 = inlined_call_operand.vmem [shape: f32[1,256], index: 2, kind: input, shape index: {}]   ;;  %s4862_s3 = inlined_call_operand.vmem [shape: bf16[256,128], index: 3, kind: input, shape index: {}]   ;;  %s4863_s4 = inlined_call_operand.vmem [shape: f32[1,128], index: 4, kind: input, shape index: {}]   ;;  %s4864_s5 = inlined_call_operand.vmem [shape: bf16[1152,128], index: 5, kind: input, shape index: {}]   ;;  %s4865_s6 = inlined_call_operand.vmem [shape: f32[1,128], index: 6, kind: input, shape index: {}]   ;;  %s4866_s7 = inlined_call_operand.vmem [shape: bf16[128,256], index: 7, kind: input, shape index: {}]   ;;  %s4867_s8 = inlined_call_operand.vmem [shape: f32[1,256], index: 8, kind: input, shape index: {}]   ;;  %s4868_s9 = inlined_call_operand.hbm [shape: f32[2,64,128], index: 9, kind: output, shape index: {}]  }
   0x1   :  { %16 = vsyncpa [#allocation3 + $0x1], 0  ;;  %s3680_s30 = smov 0   ;;  %s3682_s10 = smov 0  }
   0x2   :  { %s3684_s11 = smov 0   ;;  %s3686_s12 = smov 0  }
   0x3 LB: > { %s3701_s13 = sadd.s32 4294967295, %s3625_s12   ;;  %s2812_s14 = sadd.s32 4294967294, %s3625_s12   ;;  %s3625_s12 = sphi %s3686_s12, %s4874_s12   ;;  %s3621_s11 = sphi %s3684_s11, %s4873_s11   ;;  %s3617_s10 = sphi %s3682_s10, %s4872_s10   ;;  %s3613_s30 = sphi %s3680_s30, %s4871_s30  }
   0x4   : > { %s3705_s15 = sadd.s32 1, %s3625_s12   ;;  %s223_s16 = sadd.s32 1, %s3621_s11 }
   0x5   : > { %s220_s17 = ssub.s32 %s3625_s12, %s3705_s15  ;;  %p233_p0 = scmp.ne.s32.totalorder %s3621_s11, %s3617_s10 }
   0x6   : > { %p221_p1 = scmp.eq.s32.totalorder %s220_s17, 0  ;;  %p234_p2 = scmp.eq.s32.totalorder %s3701_s13, 1 }
   0x7   : > { %p239_p3 = scmp.ne.s32.totalorder %s3617_s10, %s3613_s30  ;;  %p240_p4 = scmp.eq.s32.totalorder %s2812_s14, 1 }
   0x8   : > { %s3716_s18 = scalar_select %p221_p1, %s3621_s11, %s223_s16  }
   0x9   : > { %p3718_p5 = por %p234_p2, %p233_p0  ;;  %p3722_p6 = por %p240_p4, %p239_p3 }
   0xa   : > { %p2815_p7 = scmp.ge.s32.totalorder %s3625_s12, 1  ;;  %p290_p8 = scmp.lt.s32.totalorder %s3625_s12, 3 }
   0xc   : > { %p291_p9 = pnand %p2815_p7, %p290_p8 }
   0xd   : > { %p326_p10 = scmp.lt.s32.totalorder (!%p291_p9), %s3701_s13, 1  ;;  %s323_s17 = sand.u32 (!%p291_p9), 1, %s3617_s10  }
   0xe   : > { %294 = sbr.rel (%p291_p9) target bundleno = 1164 (0x48c), region = 56  ;;  %s3417_s23 = sshll.u32 (!%p291_p9), %s3701_s13, 6 }
   0xf   : > { %s2746_s25 = scalar_lea.hbm (!%p291_p9), %s4868_s9, %s3417_s23  ;;  %s3583_s24 = scalar_lea.hbm (!%p291_p9), %s4868_s9, 128 }
  0x10   : > { %s2749_s14 = sshll.u32 (!%p291_p9), %s2746_s25, 4  ;;  %s2750_s14 = int_to_ptr.hbm [resolvable:$true] %s2749_s14 }
  0x11   : > { %s3577_s16 = sshra.s32 (!%p291_p9), %s2750_s14, 4  ;;  %s3578_s16 = int_to_ptr.hbm [resolvable:$true] %s3577_s16 }
  0x12   : > { %p3584_p0 = scmp.lt.s32.totalorder (!%p291_p9), %s3578_s16, %s4868_s9 }
  0x13   : > { %v2845_v0 = vld [vmem:[%s4860_s1 + $0x30] sm:$0xf]  ;;  %v3312_v1 = vld [vmem:[%s4860_s1 + $0x34] sm:$0xf0]  ;;  %v2837_v2 = vld [vmem:[%s4860_s1 + $0x20] sm:$0xf] }
  0x14   : > { %v2846_v3 = vor.u32 %v3312_v1, %v2845_v0  ;;  %v3310_v4 = vld [vmem:[%s4860_s1 + $0x24] sm:$0xf0]  ;;  %v2829_v6 = vld [vmem:[%s4860_s1 + $0x10] sm:$0xf]  ;;  %v3308_v7 = vld [vmem:[%s4860_s1 + $0x14] sm:$0xf0] }
  0x15   : > { %v2838_v5 = vor.u32 %v3310_v4, %v2837_v2  ;;  %s327_s21 = scalar_select %p326_p10, %s3701_s13, 1  ;;  %v2830_v8 = vor.u32 %v3308_v7, %v2829_v6  ;;  %v2821_v9 = vld [vmem:[%s4860_s1] sm:$0xf]  ;;  %v3306_v10 = vld [vmem:[%s4860_s1 + $0x4] sm:$0xf0]  ;;  %vm530_vm0 = vcmask 523264  }
  0x16   : > { %583 = vmatpush.bf16.msra.mxu0 %v2846_v3  ;;  %3497 = vmatpush.bf16.msra.mxu1 %v2846_v3  ;;  %v3311_v17 = vld [vmem:[%s4860_s1 + $0x34] sm:$0xf]  ;;  %v2847_v18 = vld [vmem:[%s4860_s1 + $0x38] sm:$0xf0]  ;;  %v2822_v19 = vor.u32 %v3306_v10, %v2821_v9  ;;  %v3309_v25 = vld [vmem:[%s4860_s1 + $0x24] sm:$0xf] }
  0x17   : > { %s3304_s22 = sshll.u32 %s327_s21, 7  ;;  %v2850_v24 = vor.u32 %v3311_v17, %v2847_v18  ;;  %v2839_v30 = vld [vmem:[%s4860_s1 + $0x28] sm:$0xf0]  ;;  %v3307_v36 = vld [vmem:[%s4860_s1 + $0x14] sm:$0xf]  ;;  %vm1315_vm1 = vcmask 1040384  }
  0x18   : > { %s3757_s29 = scalar_lea.vmem %s4859_s0, %s3304_s22  ;;  %v2842_v35 = vor.u32 %v3309_v25, %v2839_v30  ;;  %v2831_v37 = vld [vmem:[%s4860_s1 + $0x18] sm:$0xf0]  ;;  %v3305_v43 = vld [vmem:[%s4860_s1 + $0x4] sm:$0xf]  ;;  %v2823_v44 = vld [vmem:[%s4860_s1 + $0x8] sm:$0xf0] }
  0x19   : > { %v3419_v11 = vld [vmem:[%s3757_s29] sm:$0xff]   ;;  %v3495_v12 = vld [vmem:[%s3757_s29 + $0x70] sm:$0xff]   ;;  %v3482_v33 = vld [vmem:[%s3757_s29 + $0x8] sm:$0xff]   ;;  %v2834_v42 = vor.u32 %v3307_v36, %v2831_v37  ;;  %v2826_v49 = vor.u32 %v3305_v43, %v2823_v44  ;;  %s2816_s21 = sshll.u32 %s323_s17, 6  ;;  %s2735_s13 = scalar_lea.sflag [#allocation3], %s323_s17 }
  0x1a   : > { %584 = vmatpush.bf16.msra.mxu0 %v2838_v5  ;;  %3498 = vmatpush.bf16.msra.mxu1 %v2838_v5  ;;  %v3420_v13 = vunpack.c.l.bf16 %v3419_v11  ;;  %v3421_v14 = vunpack.c.h.bf16 %v3419_v11  ;;  %v3476_v15 = vunpack.c.l.bf16 %v3495_v12  ;;  %v3477_v16 = vunpack.c.h.bf16 %v3495_v12  ;;  %v3496_v34 = vld [vmem:[%s3757_s29 + $0x78] sm:$0xff]   ;;  %v3483_v56 = vld [vmem:[%s3757_s29 + $0x10] sm:$0xff]   ;;  %v3314_v44 = vld [vmem:[%s4862_s3 + $0x8] sm:$0xff]  ;;  %s4806_s22 = scalar_lea.vmem [#allocation2], %s2816_s21  ;;  %s3579_s21 = scalar_lea.hbm %s3578_s16, 64 }
  0x1b   : > { %v3424_v38 = vunpack.c.l.bf16 %v3482_v33  ;;  %v3425_v39 = vunpack.c.h.bf16 %v3482_v33  ;;  %v3480_v40 = vunpack.c.l.bf16 %v3496_v34  ;;  %v3481_v41 = vunpack.c.h.bf16 %v3496_v34  ;;  %v3484_v0 = vld [vmem:[%s3757_s29 + $0x18] sm:$0xff]   ;;  %v3487_v25 = vld [vmem:[%s3757_s29 + $0x30] sm:$0xff]   ;;  %v3317_v33 = vld [vmem:[%s4862_s3 + $0x20] sm:$0xff]  ;;  %s2747_s28 = sshll.u32 %s4806_s22, 4  ;;  %p3580_p11 = scmp.ne.s32.totalorder %s3578_s16, %s3579_s21  ;;  %s2748_s28 = int_to_ptr.vmem [resolvable:$true] %s2747_s28 }
  0x1c   : > { %v396_v20 = vmax.f32 %v3420_v13, 0.0  ;;  %v397_v21 = vmax.f32 %v3421_v14, 0.0  ;;  %v424_v22 = vmax.f32 %v3476_v15, 0.0  ;;  %v425_v23 = vmax.f32 %v3477_v16, 0.0  ;;  %v3486_v16 = vld [vmem:[%s3757_s29 + $0x28] sm:$0xff]   ;;  %v3488_v37 = vld [vmem:[%s3757_s29 + $0x38] sm:$0xff]   ;;  %p3585_p1 = scmp.lt.s32.totalorder %s3583_s24, %s3579_s21 }
  0x1d   : > { %v398_v45 = vmax.f32 %v3424_v38, 0.0  ;;  %v399_v46 = vmax.f32 %v3425_v39, 0.0  ;;  %v426_v47 = vmax.f32 %v3480_v40, 0.0  ;;  %v427_v48 = vmax.f32 %v3481_v41, 0.0  ;;  %v3316_v38 = vld [vmem:[%s4862_s3 + $0x18] sm:$0xff]  ;;  %v3315_v41 = vld [vmem:[%s4862_s3 + $0x10] sm:$0xff]  ;;  %p3581_p12 = pnand %p3580_p11, %p3718_p5 }
  0x1e   : > { %585 = vmatpush.bf16.msra.mxu0 %v2830_v8  ;;  %3499 = vmatpush.bf16.msra.mxu1 %v2830_v8  ;;  %v428_v26 = vmin.f32 %v396_v20, 6.0  ;;  %v429_v27 = vmin.f32 %v397_v21, 6.0  ;;  %v456_v28 = vmin.f32 %v424_v22, 6.0  ;;  %v457_v29 = vmin.f32 %v425_v23, 6.0  ;;  %v3485_v8 = vld [vmem:[%s3757_s29 + $0x20] sm:$0xff]   ;;  %p3586_p2 = por %p3585_p1, %p3584_p0 }
  0x1f   : > { %v430_v50 = vmin.f32 %v398_v45, 6.0  ;;  %v431_v51 = vmin.f32 %v399_v46, 6.0  ;;  %v458_v52 = vmin.f32 %v426_v47, 6.0  ;;  %v459_v53 = vmin.f32 %v427_v48, 6.0  ;;  %v3313_v47 = vld [vmem:[%s4862_s3] sm:$0xff]  ;;  %p3582_p13 = pneg %p3581_p12 }
  0x20   : > { %v460_v31 = vpack.c.bf16 %v429_v27, %v428_v26  ;;  %v3773_v32 = vpack.c.bf16 %v457_v29, %v456_v28  ;;  %v3428_v57 = vunpack.c.l.bf16 %v3483_v56  ;;  %v3429_v58 = vunpack.c.h.bf16 %v3483_v56  ;;  %v3319_v28 = vld [vmem:[%s4862_s3 + $0x30] sm:$0xff]  ;;  %v3318_v29 = vld [vmem:[%s4862_s3 + $0x28] sm:$0xff] }
  0x21   : > { %v461_v54 = vpack.c.bf16 %v431_v51, %v430_v50  ;;  %v3792_v55 = vpack.c.bf16 %v459_v53, %v458_v52  ;;  %v3432_v1 = vunpack.c.l.bf16 %v3484_v0  ;;  %v3433_v2 = vunpack.c.h.bf16 %v3484_v0  ;;  %v3328_v50 = vld [vmem:[%s4862_s3 + $0x78] sm:$0xff]  ;;  %v3327_v53 = vld [vmem:[%s4862_s3 + $0x70] sm:$0xff]  ;;  %p3587_p3 = pnand %p3586_p2, %p3582_p13 }
  0x22   : > { %586 = vmatpush.bf16.msra.mxu0 %v2822_v19  ;;  %3500 = vmatpush.bf16.msra.mxu1 %v2822_v19  ;;  %v400_v59 = vmax.f32 %v3428_v57, 0.0  ;;  %v401_v60 = vmax.f32 %v3429_v58, 0.0  ;;  %v3436_v9 = vunpack.c.l.bf16 %v3485_v8  ;;  %v3437_v10 = vunpack.c.h.bf16 %v3485_v8  ;;  %v3320_v19 = vld [vmem:[%s4862_s3 + $0x38] sm:$0xff]  ;;  %v3326_v57 = vld [vmem:[%s4862_s3 + $0x68] sm:$0xff] }
  0x23   : > { %v402_v3 = vmax.f32 %v3432_v1, 0.0  ;;  %v403_v4 = vmax.f32 %v3433_v2, 0.0  ;;  %v3440_v17 = vunpack.c.l.bf16 %v3486_v16  ;;  %v3441_v18 = vunpack.c.h.bf16 %v3486_v16  ;;  %1049 = vmatpush.bf16.msra.mxu2 %v3320_v19  ;;  %1138 = vmatpush.bf16.msra.mxu3 %v3328_v50  ;;  %v3324_v2 = vld [vmem:[%s4862_s3 + $0x58] sm:$0xff] }
  0x24   : > { %v432_v61 = vmin.f32 %v400_v59, 6.0  ;;  %v433_v62 = vmin.f32 %v401_v60, 6.0  ;;  %v404_v11 = vmax.f32 %v3436_v9, 0.0  ;;  %v405_v12 = vmax.f32 %v3437_v10, 0.0  ;;  %v3325_v60 = vld [vmem:[%s4862_s3 + $0x60] sm:$0xff] }
  0x25   : > { %2851 = vmatmul.msk.bf16.vlgmr.msra.gmra.mxu0 %vm530_vm0, %v460_v31  ;;  %2865 = vmatmul.msk.bf16.vlgmr.msra.gmra.mxu1 %vm530_vm0, %v3773_v32  ;;  %v434_v5 = vmin.f32 %v402_v3, 6.0  ;;  %v435_v6 = vmin.f32 %v403_v4, 6.0  ;;  %v406_v20 = vmax.f32 %v3440_v17, 0.0  ;;  %v407_v21 = vmax.f32 %v3441_v18, 0.0 }
  0x26   : > { %672 = vmatpush.bf16.msrb.mxu1 %v2850_v24  ;;  %v462_v63 = vpack.c.bf16 %v433_v62, %v432_v61  ;;  %v436_v13 = vmin.f32 %v404_v11, 6.0  ;;  %v437_v14 = vmin.f32 %v405_v12, 6.0  ;;  %v3444_v26 = vunpack.c.l.bf16 %v3487_v25  ;;  %v3858_v61 = vld [vmem:[%s4861_s2] sm:$0x3] }
  0x27   : > { %v463_v7 = vpack.c.bf16 %v435_v6, %v434_v5  ;;  %v438_v22 = vmin.f32 %v406_v20, 6.0  ;;  %v439_v23 = vmin.f32 %v407_v21, 6.0  ;;  %v3445_v27 = vunpack.c.h.bf16 %v3487_v25  ;;  %1050 = vmatpush.bf16.msra.mxu2 %v3319_v28  ;;  %1139 = vmatpush.bf16.msra.mxu3 %v3327_v53 }
  0x28   : > { %v464_v15 = vpack.c.bf16 %v437_v14, %v436_v13  ;;  %v408_v30 = vmax.f32 %v3444_v26, 0.0  ;;  %v3448_v39 = vunpack.c.l.bf16 %v3488_v37  ;;  %v3449_v40 = vunpack.c.h.bf16 %v3488_v37  ;;  %v3322_v14 = vld [vmem:[%s4862_s3 + $0x48] sm:$0xff] }
  0x29   : > { %v465_v24 = vpack.c.bf16 %v439_v23, %v438_v22  ;;  %v3867_v3 = vperm.slane %v3858_v61, 0  ;;  %v3321_v23 = vld [vmem:[%s4862_s3 + $0x40] sm:$0xff] }
  0x2a   : > { %673 = vmatpush.bf16.msrb.mxu1 %v2842_v35  ;;  %v440_v34 = vmin.f32 %v408_v30, 6.0  ;;  %v411_v43 = vmax.f32 %v3449_v40, 0.0 }
  0x2b   : > { %1051 = vmatpush.bf16.msra.mxu2 %v3318_v29  ;;  %1140 = vmatpush.bf16.msra.mxu3 %v3326_v57  ;;  %v3491_v29 = vld [vmem:[%s3757_s29 + $0x50] sm:$0xff]   ;;  %v3492_v57 = vld [vmem:[%s3757_s29 + $0x58] sm:$0xff]  }
  0x2c   : > { %v443_v46 = vmin.f32 %v411_v43, 6.0 }
  0x2e   : > { %674 = vmatpush.bf16.msrb.mxu1 %v2834_v42  ;;  %v410_v42 = vmax.f32 %v3448_v39, 0.0 }
  0x2f   : > { %1052 = vmatpush.bf16.msra.mxu2 %v3317_v33  ;;  %1141 = vmatpush.bf16.msra.mxu3 %v3325_v60 }
  0x30   : > { %v442_v45 = vmin.f32 %v410_v42, 6.0 }
  0x32   : > { %675 = vmatpush.bf16.msrb.mxu1 %v2826_v49  ;;  %v3837_v48 = vpack.c.bf16 %v443_v46, %v442_v45  ;;  %v3489_v49 = vld [vmem:[%s3757_s29 + $0x40] sm:$0xff]  }
  0x33   : > { %1053 = vmatpush.bf16.msra.mxu2 %v3316_v38  ;;  %v3452_v51 = vunpack.c.l.bf16 %v3489_v49  ;;  %v3453_v52 = vunpack.c.h.bf16 %v3489_v49  ;;  %1142 = vmatpush.bf16.msra.mxu3 %v3324_v2  ;;  %v3465_v2 = vunpack.c.h.bf16 %v3492_v57 }
  0x35   : > { %2852 = vmatmul.msk.bf16.gmra.mxu0 %vm530_vm0, %v461_v54  ;;  %2866 = vmatmul.msk.bf16.gmra.mxu1 %vm530_vm0, %v3792_v55  ;;  %v413_v56 = vmax.f32 %v3453_v52, 0.0 }
  0x37   : > { %1054 = vmatpush.bf16.msra.mxu2 %v3315_v41  ;;  %v445_v59 = vmin.f32 %v413_v56, 6.0 }
  0x3b   : > { %1055 = vmatpush.bf16.msra.mxu2 %v3314_v44 }
  0x3f   : > { %1056 = vmatpush.bf16.msra.mxu2 %v3313_v47 }
  0x45   : > { %2853 = vmatmul.msk.bf16.gmra.mxu0 %vm530_vm0, %v462_v63  ;;  %2867 = vmatmul.msk.bf16.vlgmr.msrb.gmra.mxu1 %vm530_vm0, %v460_v31  ;;  %v409_v31 = vmax.f32 %v3445_v27, 0.0 }
  0x47   : > { %v441_v35 = vmin.f32 %v409_v31, 6.0 }
  0x49   : > { %v466_v36 = vpack.c.bf16 %v441_v35, %v440_v34  ;;  %v3460_v34 = vunpack.c.l.bf16 %v3491_v29 }
  0x4b   : > { %v416_v38 = vmax.f32 %v3460_v34, 0.0 }
  0x4d   : > { %v448_v46 = vmin.f32 %v416_v38, 6.0 }
  0x55   : > { %2854 = vmatmul.msk.bf16.gmra.mxu0 %vm530_vm0, %v463_v7  ;;  %2868 = vmatmul.msk.bf16.gmra.mxu1 %vm530_vm0, %v461_v54  ;;  %v412_v54 = vmax.f32 %v3452_v51, 0.0 }
  0x57   : > { %v444_v58 = vmin.f32 %v412_v54, 6.0 }
  0x59   : > { %v3860_v62 = vpack.c.bf16 %v445_v59, %v444_v58 }
  0x65   : > { %2855 = vmatmul.msk.bf16.gmra.mxu0 %vm530_vm0, %v464_v15  ;;  %2869 = vmatmul.msk.bf16.gmra.mxu1 %vm530_vm0, %v462_v63  ;;  %v3490_v63 = vld [vmem:[%s3757_s29 + $0x48] sm:$0xff]  }
  0x66   : > { %v3456_v4 = vunpack.c.l.bf16 %v3490_v63  ;;  %v3457_v6 = vunpack.c.h.bf16 %v3490_v63  ;;  %v3912_v63 = vperm.slane %v3858_v61, 1 }
  0x68   : > { %v414_v9 = vmax.f32 %v3456_v4, 0.0  ;;  %v415_v11 = vmax.f32 %v3457_v6, 0.0 }
  0x6a   : > { %v446_v18 = vmin.f32 %v414_v9, 6.0  ;;  %v447_v22 = vmin.f32 %v415_v11, 6.0 }
  0x6c   : > { %v3889_v28 = vpack.c.bf16 %v447_v22, %v446_v18  ;;  %v3493_v22 = vld [vmem:[%s3757_s29 + $0x60] sm:$0xff]  }
  0x75   : > { %2856 = vmatmul.msk.bf16.gmra.mxu0 %vm530_vm0, %v465_v24  ;;  %2870 = vmatmul.msk.bf16.gmra.mxu1 %vm530_vm0, %v463_v7  ;;  %v3323_v7 = vld [vmem:[%s4862_s3 + $0x50] sm:$0xff] }
  0x76   : > { %1143 = vmatpush.bf16.msra.mxu3 %v3323_v7  ;;  %v419_v7 = vmax.f32 %v3465_v2, 0.0 }
  0x7a   : > { %1144 = vmatpush.bf16.msra.mxu3 %v3322_v14 }
  0x7e   : > { %1145 = vmatpush.bf16.msra.mxu3 %v3321_v23 }
  0x85   : > { %2857 = vmatmul.msk.bf16.gmra.mxu0 %vm530_vm0, %v466_v36  ;;  %2871 = vmatmul.msk.bf16.gmra.mxu1 %vm530_vm0, %v464_v15 }
  0x95   : > { %2858 = vmatmul.msk.bf16.gmra.mxu0 %vm530_vm0, %v3837_v48  ;;  %2872 = vmatmul.msk.bf16.gmra.mxu1 %vm530_vm0, %v465_v24 }
  0xa2   : > { %v588_v0 = vpop.f32.mrf.mxu0  ;;  %v658_v1 = vpop.f32.mrf.mxu1 }
  0xa3   : > { %v589_v5 = vadd.f32 %v588_v0, %v3867_v3  ;;  %v659_v8 = vadd.f32 %v658_v1, %v3867_v3  ;;  %v3464_v0 = vunpack.c.l.bf16 %v3492_v57 }
  0xa5   : > { %2859 = vmatmul.msk.bf16.gmra.mxu0 %vm530_vm0, %v3860_v62  ;;  %2873 = vmatmul.msk.bf16.gmra.mxu1 %vm530_vm0, %v466_v36  ;;  %v757_v10 = vmax.f32 %v589_v5, 0.0  ;;  %v813_v15 = vmax.f32 %v659_v8, 0.0  ;;  %v3461_v36 = vunpack.c.h.bf16 %v3491_v29  ;;  %v418_v5 = vmax.f32 %v3464_v0, 0.0 }
  0xa7   : > { %v821_v19 = vmin.f32 %v757_v10, 6.0  ;;  %v3885_v24 = vmin.f32 %v813_v15, 6.0  ;;  %v417_v40 = vmax.f32 %v3461_v36, 0.0 }
  0xa9   : > { %v449_v51 = vmin.f32 %v417_v40, 6.0 }
  0xaa   : > { %v590_v12 = vpop.f32.mrf.mxu0  ;;  %v660_v13 = vpop.f32.mrf.mxu1 }
  0xab   : > { %v591_v16 = vadd.f32 %v590_v12, %v3867_v3  ;;  %v661_v17 = vadd.f32 %v660_v13, %v3867_v3  ;;  %v3906_v56 = vpack.c.bf16 %v449_v51, %v448_v46  ;;  %v450_v12 = vmin.f32 %v418_v5, 6.0 }
  0xad   : > { %v759_v20 = vmax.f32 %v591_v16, 0.0  ;;  %v815_v21 = vmax.f32 %v661_v17, 0.0  ;;  %v451_v16 = vmin.f32 %v419_v7, 6.0 }
  0xaf   : > { %v823_v25 = vmin.f32 %v759_v20, 6.0  ;;  %v3887_v26 = vmin.f32 %v815_v21, 6.0  ;;  %v3922_v21 = vpack.c.bf16 %v451_v16, %v450_v12 }
  0xb1   : > { %v885_v27 = vpack.c.bf16 %v823_v25, %v821_v19  ;;  %v913_v30 = vpack.c.bf16 %v3887_v26, %v3885_v24 }
  0xb2   : > { %v593_v31 = vpop.f32.mrf.mxu0  ;;  %v663_v33 = vpop.f32.mrf.mxu1 }
  0xb3   : > { %1057 = vmatmul.bf16.vlgmr.msra.gmra.mxu2 %v885_v27  ;;  %v594_v35 = vadd.f32 %v593_v31, %v3867_v3  ;;  %v664_v37 = vadd.f32 %v663_v33, %v3867_v3  ;;  %v3468_v27 = vunpack.c.l.bf16 %v3493_v22  ;;  %v3469_v31 = vunpack.c.h.bf16 %v3493_v22 }
  0xb5   : > { %2860 = vmatmul.msk.bf16.gmra.mxu0 %vm530_vm0, %v3889_v28  ;;  %2874 = vmatmul.msk.bf16.gmra.mxu1 %vm530_vm0, %v3837_v48  ;;  %v761_v39 = vmax.f32 %v594_v35, 0.0  ;;  %v817_v43 = vmax.f32 %v664_v37, 0.0  ;;  %v420_v34 = vmax.f32 %v3468_v27, 0.0  ;;  %v421_v36 = vmax.f32 %v3469_v31, 0.0 }
  0xb7   : > { %v825_v47 = vmin.f32 %v761_v39, 6.0  ;;  %v3902_v48 = vmin.f32 %v817_v43, 6.0  ;;  %v453_v46 = vmin.f32 %v421_v36, 6.0 }
  0xba   : > { %v595_v41 = vpop.f32.mrf.mxu0  ;;  %v665_v42 = vpop.f32.mrf.mxu1 }
  0xbb   : > { %v596_v44 = vadd.f32 %v595_v41, %v3867_v3  ;;  %v666_v45 = vadd.f32 %v665_v42, %v3867_v3  ;;  %v452_v42 = vmin.f32 %v420_v34, 6.0 }
  0xbd   : > { %v763_v49 = vmax.f32 %v596_v44, 0.0  ;;  %v819_v50 = vmax.f32 %v666_v45, 0.0 }
  0xbf   : > { %v827_v52 = vmin.f32 %v763_v49, 6.0  ;;  %v3904_v53 = vmin.f32 %v819_v50, 6.0 }
  0xc1   : > { %v887_v54 = vpack.c.bf16 %v827_v52, %v825_v47  ;;  %v915_v58 = vpack.c.bf16 %v3904_v53, %v3902_v48  ;;  %v472_v52 = vpack.c.bf16 %v453_v46, %v452_v42 }
  0xc2   : > { %v598_v59 = vpop.f32.mrf.mxu0  ;;  %v677_v60 = vpop.f32.mrf.mxu1 }
  0xc3   : > { %1062 = vmatmul.bf16.gmra.mxu2 %v887_v54  ;;  %v599_v1 = vadd.f32 %v598_v59, %v3867_v3  ;;  %v678_v4 = vadd.f32 %v677_v60, %v3912_v63  ;;  %v3494_v54 = vld [vmem:[%s3757_s29 + $0x68] sm:$0xff]  }
  0xc4   : > { %v3472_v60 = vunpack.c.l.bf16 %v3494_v54 }
  0xc5   : > { %2861 = vmatmul.msk.bf16.gmra.mxu0 %vm530_vm0, %v3906_v56  ;;  %2875 = vmatmul.msk.bf16.gmra.mxu1 %vm530_vm0, %v3860_v62  ;;  %v765_v6 = vmax.f32 %v599_v1, 0.0  ;;  %v758_v9 = vmax.f32 %v678_v4, 0.0  ;;  %v3473_v1 = vunpack.c.h.bf16 %v3494_v54 }
  0xc6   : > { %v422_v4 = vmax.f32 %v3472_v60, 0.0 }
  0xc7   : > { %v829_v13 = vmin.f32 %v765_v6, 6.0  ;;  %v822_v62 = vmin.f32 %v758_v9, 6.0  ;;  %v423_v6 = vmax.f32 %v3473_v1, 0.0 }
  0xca   : > { %v600_v8 = vpop.f32.mrf.mxu0  ;;  %v679_v61 = vpop.f32.mrf.mxu1 }
  0xcb   : > { %v601_v10 = vadd.f32 %v600_v8, %v3867_v3  ;;  %v680_v11 = vadd.f32 %v679_v61, %v3912_v63 }
  0xcd   : > { %v767_v14 = vmax.f32 %v601_v10, 0.0  ;;  %v760_v15 = vmax.f32 %v680_v11, 0.0  ;;  %v454_v11 = vmin.f32 %v422_v4, 6.0 }
  0xcf   : > { %v831_v17 = vmin.f32 %v767_v14, 6.0  ;;  %v824_v18 = vmin.f32 %v760_v15, 6.0  ;;  %v455_v15 = vmin.f32 %v423_v6, 6.0 }
  0xd1   : > { %v889_v19 = vpack.c.bf16 %v831_v17, %v829_v13  ;;  %v886_v20 = vpack.c.bf16 %v824_v18, %v822_v62 }
  0xd2   : > { %v603_v23 = vpop.f32.mrf.mxu0  ;;  %v682_v25 = vpop.f32.mrf.mxu1 }
  0xd3   : > { %1067 = vmatmul.bf16.gmra.mxu2 %v889_v19  ;;  %1146 = vmatmul.bf16.vlgmr.msra.gmra.mxu3 %v886_v20  ;;  %v604_v29 = vadd.f32 %v603_v23, %v3867_v3  ;;  %v683_v33 = vadd.f32 %v682_v25, %v3912_v63  ;;  %v473_v19 = vpack.c.bf16 %v455_v15, %v454_v11 }
  0xd5   : > { %2862 = vmatmul.msk.bf16.gmra.mxu0 %vm530_vm0, %v3922_v21  ;;  %2876 = vmatmul.msk.bf16.gmra.mxu1 %vm530_vm0, %v3889_v28  ;;  %v769_v35 = vmax.f32 %v604_v29, 0.0  ;;  %v762_v39 = vmax.f32 %v683_v33, 0.0 }
  0xd7   : > { %v833_v43 = vmin.f32 %v769_v35, 6.0  ;;  %v826_v28 = vmin.f32 %v762_v39, 6.0 }
  0xda   : > { %v605_v37 = vpop.f32.mrf.mxu0  ;;  %v684_v38 = vpop.f32.mrf.mxu1 }
  0xdb   : > { %v606_v40 = vadd.f32 %v605_v37, %v3867_v3  ;;  %v685_v41 = vadd.f32 %v684_v38, %v3912_v63 }
  0xdd   : > { %v771_v44 = vmax.f32 %v606_v40, 0.0  ;;  %v764_v45 = vmax.f32 %v685_v41, 0.0 }
  0xdf   : > { %v835_v47 = vmin.f32 %v771_v44, 6.0  ;;  %v828_v49 = vmin.f32 %v764_v45, 6.0 }
  0xe1   : > { %v891_v50 = vpack.c.bf16 %v835_v47, %v833_v43  ;;  %v888_v51 = vpack.c.bf16 %v828_v49, %v826_v28 }
  0xe2   : > { %v608_v57 = vpop.f32.mrf.mxu0  ;;  %v687_v59 = vpop.f32.mrf.mxu1 }
  0xe3   : > { %1072 = vmatmul.bf16.gmra.mxu2 %v891_v50  ;;  %1151 = vmatmul.bf16.gmra.mxu3 %v888_v51  ;;  %v609_v0 = vadd.f32 %v608_v57, %v3867_v3  ;;  %v688_v2 = vadd.f32 %v687_v59, %v3912_v63 }
  0xe5   : > { %2863 = vmatmul.msk.bf16.gmra.mxu0 %vm530_vm0, %v472_v52  ;;  %2877 = vmatmul.msk.bf16.gmra.mxu1 %vm530_vm0, %v3906_v56  ;;  %v773_v5 = vmax.f32 %v609_v0, 0.0  ;;  %v766_v61 = vmax.f32 %v688_v2, 0.0 }
  0xe7   : > { %v837_v12 = vmin.f32 %v773_v5, 6.0  ;;  %v830_v16 = vmin.f32 %v766_v61, 6.0 }
  0xea   : > { %v610_v7 = vpop.f32.mrf.mxu0  ;;  %v689_v8 = vpop.f32.mrf.mxu1 }
  0xeb   : > { %v611_v9 = vadd.f32 %v610_v7, %v3867_v3  ;;  %v690_v10 = vadd.f32 %v689_v8, %v3912_v63 }
  0xed   : > { %v775_v13 = vmax.f32 %v611_v9, 0.0  ;;  %v768_v14 = vmax.f32 %v690_v10, 0.0 }
  0xef   : > { %v839_v56 = vmin.f32 %v775_v13, 6.0  ;;  %v832_v62 = vmin.f32 %v768_v14, 6.0 }
  0xf1   : > { %v893_v17 = vpack.c.bf16 %v839_v56, %v837_v12  ;;  %v890_v18 = vpack.c.bf16 %v832_v62, %v830_v16 }
  0xf2   : > { %v613_v20 = vpop.f32.mrf.mxu0  ;;  %v692_v22 = vpop.f32.mrf.mxu1 }
  0xf3   : > { %1077 = vmatmul.bf16.gmra.mxu2 %v893_v17  ;;  %1156 = vmatmul.bf16.gmra.mxu3 %v890_v18  ;;  %v614_v23 = vadd.f32 %v613_v20, %v3867_v3  ;;  %v693_v25 = vadd.f32 %v692_v22, %v3912_v63 }
  0xf5   : > { %2864 = vmatmul.msk.bf16.gmra.mxu0 %vm530_vm0, %v473_v19  ;;  %2878 = vmatmul.msk.bf16.gmra.mxu1 %vm530_vm0, %v3922_v21  ;;  %v777_v27 = vmax.f32 %v614_v23, 0.0  ;;  %v770_v33 = vmax.f32 %v693_v25, 0.0 }
  0xf7   : > { %v841_v36 = vmin.f32 %v777_v27, 6.0  ;;  %v834_v39 = vmin.f32 %v770_v33, 6.0  ;;  %v3336_v27 = vld [vmem:[%s4864_s5 + $0x38] sm:$0xff] }
  0xf8   : > { %2155 = vmatpush.bf16.msrb.mxu0 %v3336_v27 }
  0xfa   : > { %v615_v29 = vpop.f32.mrf.mxu0  ;;  %v694_v31 = vpop.f32.mrf.mxu1 }
  0xfb   : > { %v616_v34 = vadd.f32 %v615_v29, %v3867_v3  ;;  %v695_v35 = vadd.f32 %v694_v31, %v3912_v63 }
  0xfd   : > { %v779_v37 = vmax.f32 %v616_v34, 0.0  ;;  %v772_v38 = vmax.f32 %v695_v35, 0.0 }
  0xff   : > { %v843_v40 = vmin.f32 %v779_v37, 6.0  ;;  %v836_v41 = vmin.f32 %v772_v38, 6.0 }
 0x101   : > { %v895_v42 = vpack.c.bf16 %v843_v40, %v841_v36  ;;  %v892_v43 = vpack.c.bf16 %v836_v41, %v834_v39 }
 0x102   : > { %v618_v44 = vpop.f32.mrf.mxu0  ;;  %v697_v21 = vpop.f32.mrf.mxu1 }
 0x103   : > { %1082 = vmatmul.bf16.gmra.mxu2 %v895_v42  ;;  %1161 = vmatmul.bf16.gmra.mxu3 %v892_v43  ;;  %v619_v45 = vadd.f32 %v618_v44, %v3867_v3  ;;  %v698_v46 = vadd.f32 %v697_v21, %v3912_v63 }
 0x105   : > { %2879 = vmatmul.msk.bf16.gmra.mxu1 %vm530_vm0, %v472_v52  ;;  %v781_v28 = vmax.f32 %v619_v45, 0.0  ;;  %v774_v50 = vmax.f32 %v698_v46, 0.0 }
 0x107   : > { %v845_v57 = vmin.f32 %v781_v28, 6.0  ;;  %v838_v0 = vmin.f32 %v774_v50, 6.0 }
 0x10a   : > { %v620_v47 = vpop.f32.mrf.mxu0  ;;  %v699_v49 = vpop.f32.mrf.mxu1 }
 0x10b   : > { %v621_v51 = vadd.f32 %v620_v47, %v3867_v3  ;;  %v700_v54 = vadd.f32 %v699_v49, %v3912_v63 }
 0x10d   : > { %v783_v59 = vmax.f32 %v621_v51, 0.0  ;;  %v776_v60 = vmax.f32 %v700_v54, 0.0 }
 0x10f   : > { %v847_v1 = vmin.f32 %v783_v59, 6.0  ;;  %v840_v2 = vmin.f32 %v776_v60, 6.0 }
 0x111   : > { %v897_v4 = vpack.c.bf16 %v847_v1, %v845_v57  ;;  %v894_v5 = vpack.c.bf16 %v840_v2, %v838_v0 }
 0x112   : > { %v623_v6 = vpop.f32.mrf.mxu0  ;;  %v702_v52 = vpop.f32.mrf.mxu1 }
 0x113   : > { %1087 = vmatmul.bf16.gmra.mxu2 %v897_v4  ;;  %1166 = vmatmul.bf16.gmra.mxu3 %v894_v5  ;;  %v624_v7 = vadd.f32 %v623_v6, %v3867_v3  ;;  %v703_v8 = vadd.f32 %v702_v52, %v3912_v63 }
 0x115   : > { %2880 = vmatmul.msk.bf16.gmra.mxu1 %vm530_vm0, %v473_v19  ;;  %v785_v61 = vmax.f32 %v624_v7, 0.0  ;;  %v778_v11 = vmax.f32 %v703_v8, 0.0 }
 0x117   : > { %v849_v14 = vmin.f32 %v785_v61, 6.0  ;;  %v842_v56 = vmin.f32 %v778_v11, 6.0 }
 0x11a   : > { %v625_v9 = vpop.f32.mrf.mxu0  ;;  %v704_v10 = vpop.f32.mrf.mxu1 }
 0x11b   : > { %v626_v12 = vadd.f32 %v625_v9, %v3867_v3  ;;  %v705_v13 = vadd.f32 %v704_v10, %v3912_v63 }
 0x11d   : > { %v787_v15 = vmax.f32 %v626_v12, 0.0  ;;  %v780_v16 = vmax.f32 %v705_v13, 0.0 }
 0x11f   : > { %v851_v62 = vmin.f32 %v787_v15, 6.0  ;;  %v844_v17 = vmin.f32 %v780_v16, 6.0  ;;  %v3344_v15 = vld [vmem:[%s4864_s5 + $0x78] sm:$0xff]  ;;  %v3335_v16 = vld [vmem:[%s4864_s5 + $0x30] sm:$0xff] }
 0x120   : > { %2184 = vmatpush.bf16.msra.mxu1 %v3344_v15  ;;  %2156 = vmatpush.bf16.msrb.mxu0 %v3335_v16 }
 0x121   : > { %v899_v18 = vpack.c.bf16 %v851_v62, %v849_v14  ;;  %v896_v20 = vpack.c.bf16 %v844_v17, %v842_v56  ;;  %v3360_v14 = vld [vmem:[%s4864_s5 + $0xf8] sm:$0xff] }
 0x122   : > { %v628_v22 = vpop.f32.mrf.mxu0  ;;  %v707_v19 = vpop.f32.mrf.mxu1  ;;  %2242 = vmatpush.bf16.msrb.mxu3 %v3360_v14 }
 0x123   : > { %1092 = vmatmul.bf16.gmra.mxu2 %v899_v18  ;;  %1171 = vmatmul.bf16.gmra.mxu3 %v896_v20  ;;  %v629_v23 = vadd.f32 %v628_v22, %v3867_v3  ;;  %v708_v25 = vadd.f32 %v707_v19, %v3912_v63 }
 0x125   : > { %2881 = vmatmul.msk.bf16.gmra.mxu1 %vm530_vm0, %v3773_v32  ;;  %v789_v29 = vmax.f32 %v629_v23, 0.0  ;;  %v782_v34 = vmax.f32 %v708_v25, 0.0 }
 0x127   : > { %v853_v37 = vmin.f32 %v789_v29, 6.0  ;;  %v846_v40 = vmin.f32 %v782_v34, 6.0  ;;  %v3996_v29 = vld [vmem:[%s4863_s4] ss:$0 sm:$0xff] }
 0x12a   : > { %v630_v31 = vpop.f32.mrf.mxu0  ;;  %v709_v33 = vpop.f32.mrf.mxu1 }
 0x12b   : > { %v631_v35 = vadd.f32 %v630_v31, %v3867_v3  ;;  %v710_v36 = vadd.f32 %v709_v33, %v3912_v63 }
 0x12d   : > { %v791_v38 = vmax.f32 %v631_v35, 0.0  ;;  %v784_v39 = vmax.f32 %v710_v36, 0.0 }
 0x12f   : > { %v855_v32 = vmin.f32 %v791_v38, 6.0  ;;  %v848_v41 = vmin.f32 %v784_v39, 6.0 }
 0x131   : > { %v901_v42 = vpack.c.bf16 %v855_v32, %v853_v37  ;;  %v898_v43 = vpack.c.bf16 %v848_v41, %v846_v40 }
 0x132   : > { %v633_v44 = vpop.f32.mrf.mxu0  ;;  %v712_v21 = vpop.f32.mrf.mxu1 }
 0x133   : > { %1097 = vmatmul.bf16.gmra.mxu2 %v901_v42  ;;  %1176 = vmatmul.bf16.gmra.mxu3 %v898_v43  ;;  %v634_v45 = vadd.f32 %v633_v44, %v3867_v3  ;;  %v713_v28 = vadd.f32 %v712_v21, %v3912_v63 }
 0x135   : > { %2882 = vmatmul.msk.bf16.gmra.mxu1 %vm530_vm0, %v3792_v55  ;;  %v793_v47 = vmax.f32 %v634_v45, 0.0  ;;  %v786_v51 = vmax.f32 %v713_v28, 0.0  ;;  %v3352_v55 = vld [vmem:[%s4864_s5 + $0xb8] sm:$0xff] }
 0x136   : > { %v1058_v46 = vpop.f32.mrf.mxu2  ;;  %2213 = vmatpush.bf16.msrb.mxu2 %v3352_v55 }
 0x137   : > { %v857_v59 = vmin.f32 %v793_v47, 6.0  ;;  %v850_v2 = vmin.f32 %v786_v51, 6.0  ;;  %v1059_v36 = vadd.f32 %v3996_v29, %v1058_v46 }
 0x13a   : > { %v635_v49 = vpop.f32.mrf.mxu0  ;;  %v714_v50 = vpop.f32.mrf.mxu1 }
 0x13b   : > { %v636_v54 = vadd.f32 %v635_v49, %v3867_v3  ;;  %v715_v57 = vadd.f32 %v714_v50, %v3912_v63 }
 0x13d   : > { %v795_v60 = vmax.f32 %v636_v54, 0.0  ;;  %v788_v0 = vmax.f32 %v715_v57, 0.0 }
 0x13e   : > { %v1060_v1 = vpop.f32.mrf.mxu2 }
 0x13f   : > { %v859_v4 = vmin.f32 %v795_v60, 6.0  ;;  %v852_v5 = vmin.f32 %v788_v0, 6.0  ;;  %v1061_v50 = vadd.f32 %v3996_v29, %v1060_v1  ;;  %v3351_v0 = vld [vmem:[%s4864_s5 + $0xb0] sm:$0xff] }
 0x140   : > { %2214 = vmatpush.bf16.msrb.mxu2 %v3351_v0 }
 0x141   : > { %v903_v6 = vpack.c.bf16 %v859_v4, %v857_v59  ;;  %v900_v52 = vpack.c.bf16 %v852_v5, %v850_v2 }
 0x142   : > { %v638_v7 = vpop.f32.mrf.mxu0  ;;  %v717_v8 = vpop.f32.mrf.mxu1 }
 0x143   : > { %1102 = vmatmul.bf16.gmra.mxu2 %v903_v6  ;;  %1181 = vmatmul.bf16.gmra.mxu3 %v900_v52  ;;  %v639_v61 = vadd.f32 %v638_v7, %v3867_v3  ;;  %v718_v10 = vadd.f32 %v717_v8, %v3912_v63 }
 0x145   : > { %v797_v11 = vmax.f32 %v639_v61, 0.0  ;;  %v790_v56 = vmax.f32 %v718_v10, 0.0 }
 0x146   : > { %v3977_v9 = vpop.f32.mrf.mxu2 }
 0x147   : > { %v861_v18 = vmin.f32 %v797_v11, 6.0  ;;  %v854_v23 = vmin.f32 %v790_v56, 6.0  ;;  %v1064_v61 = vadd.f32 %v3996_v29, %v3977_v9  ;;  %v3359_v9 = vld [vmem:[%s4864_s5 + $0xf0] sm:$0xff] }
 0x148   : > { %2243 = vmatpush.bf16.msrb.mxu3 %v3359_v9 }
 0x14a   : > { %v640_v12 = vpop.f32.mrf.mxu0  ;;  %v719_v13 = vpop.f32.mrf.mxu1 }
 0x14b   : > { %v641_v62 = vadd.f32 %v640_v12, %v3867_v3  ;;  %v720_v17 = vadd.f32 %v719_v13, %v3912_v63 }
 0x14d   : > { %v799_v20 = vmax.f32 %v641_v62, 0.0  ;;  %v792_v22 = vmax.f32 %v720_v17, 0.0  ;;  %v3334_v62 = vld [vmem:[%s4864_s5 + $0x28] sm:$0xff]  ;;  %v3343_v17 = vld [vmem:[%s4864_s5 + $0x70] sm:$0xff] }
 0x14e   : > { %v3991_v19 = vpop.f32.mrf.mxu2  ;;  %2157 = vmatpush.bf16.msrb.mxu0 %v3334_v62  ;;  %2185 = vmatpush.bf16.msra.mxu1 %v3343_v17 }
 0x14f   : > { %v863_v25 = vmin.f32 %v799_v20, 6.0  ;;  %v856_v27 = vmin.f32 %v792_v22, 6.0 }
 0x151   : > { %v905_v31 = vpack.c.bf16 %v863_v25, %v861_v18  ;;  %v902_v33 = vpack.c.bf16 %v856_v27, %v854_v23 }
 0x152   : > { %v643_v34 = vpop.f32.mrf.mxu0  ;;  %v722_v35 = vpop.f32.mrf.mxu1 }
 0x153   : > { %1107 = vmatmul.bf16.gmra.mxu2 %v905_v31  ;;  %1186 = vmatmul.bf16.gmra.mxu3 %v902_v33  ;;  %v644_v37 = vadd.f32 %v643_v34, %v3867_v3  ;;  %v723_v40 = vadd.f32 %v722_v35, %v3912_v63 }
 0x155   : > { %v801_v41 = vmax.f32 %v644_v37, 0.0  ;;  %v794_v44 = vmax.f32 %v723_v40, 0.0  ;;  %v1066_v37 = vadd.f32 %v3996_v29, %v3991_v19 }
 0x156   : > { %v4000_v38 = vpop.f32.mrf.mxu2  ;;  %v1147_v39 = vpop.f32.mrf.mxu3 }
 0x157   : > { %v1148_v32 = vadd.f32 %v1147_v39, %v1059_v36  ;;  %v865_v47 = vmin.f32 %v801_v41, 6.0  ;;  %v858_v57 = vmin.f32 %v794_v44, 6.0  ;;  %v1069_v19 = vadd.f32 %v3996_v29, %v4000_v38 }
 0x159   : > { %v1227_v28 = vmax.f32 %v1148_v32, 0.0 }
 0x15a   : > { %v645_v42 = vpop.f32.mrf.mxu0  ;;  %v724_v43 = vpop.f32.mrf.mxu1 }
 0x15b   : > { %v646_v21 = vadd.f32 %v645_v42, %v3867_v3  ;;  %v725_v45 = vadd.f32 %v724_v43, %v3912_v63  ;;  %v1259_v2 = vmin.f32 %v1227_v28, 6.0 }
 0x15d   : > { %v803_v49 = vmax.f32 %v646_v21, 0.0  ;;  %v796_v46 = vmax.f32 %v725_v45, 0.0  ;;  %v1386_v1 = vpack.c.bf16 %v1259_v2, %v1259_v2 }
 0x15e   : > { %v4006_v51 = vpop.f32.mrf.mxu2  ;;  %v1149_v54 = vpop.f32.mrf.mxu3 }
 0x15f   : > { %v867_v59 = vmin.f32 %v803_v49, 6.0  ;;  %v860_v60 = vmin.f32 %v796_v46, 6.0  ;;  %v1150_v4 = vadd.f32 %v1149_v54, %v1061_v50  ;;  %v4017_v16 = vunpack.c.l.b16 %v1386_v1 }
 0x161   : > { %v907_v5 = vpack.c.bf16 %v867_v59, %v865_v47  ;;  %v904_v55 = vpack.c.bf16 %v860_v60, %v858_v57  ;;  %v1228_v6 = vmax.f32 %v1150_v4, 0.0 }
 0x162   : > { %v648_v52 = vpop.f32.mrf.mxu0  ;;  %v727_v7 = vpop.f32.mrf.mxu1 }
 0x163   : > { %1112 = vmatmul.bf16.gmra.mxu2 %v907_v5  ;;  %1191 = vmatmul.bf16.gmra.mxu3 %v904_v55  ;;  %v1260_v8 = vmin.f32 %v1228_v6, 6.0  ;;  %v649_v10 = vadd.f32 %v648_v52, %v3867_v3  ;;  %v728_v14 = vadd.f32 %v727_v7, %v3912_v63 }
 0x165   : > { %v1387_v11 = vpack.c.bf16 %v1260_v8, %v1260_v8  ;;  %v805_v18 = vmax.f32 %v649_v10, 0.0  ;;  %v798_v25 = vmax.f32 %v728_v14, 0.0  ;;  %v1071_v14 = vadd.f32 %v3996_v29, %v4006_v51  ;;  %v3350_v51 = vld [vmem:[%s4864_s5 + $0xa8] sm:$0xff] }
 0x166   : > { %v4014_v12 = vpop.f32.mrf.mxu2  ;;  %v1152_v13 = vpop.f32.mrf.mxu3  ;;  %2215 = vmatpush.bf16.msrb.mxu2 %v3350_v51 }
 0x167   : > { %v1153_v15 = vadd.f32 %v1152_v13, %v1064_v61  ;;  %v4019_v56 = vunpack.c.l.b16 %v1387_v11  ;;  %v869_v34 = vmin.f32 %v805_v18, 6.0  ;;  %v862_v32 = vmin.f32 %v798_v25, 6.0 }
 0x169   : > { %v1513_v20 = vpack.c.b16 %v4019_v56, %v4017_v16  ;;  %v1229_v33 = vmax.f32 %v1153_v15, 0.0  ;;  %v3394_v16 = vld [vmem:[%s4864_s5 + $0x208] sm:$0xff]  ;;  %v3393_v56 = vld [vmem:[%s4864_s5 + $0x200] sm:$0xff] }
 0x16a   : > { %v650_v22 = vpop.f32.mrf.mxu0  ;;  %v729_v23 = vpop.f32.mrf.mxu1 }
 0x16b   : > { %v651_v27 = vadd.f32 %v650_v22, %v3867_v3  ;;  %v730_v31 = vadd.f32 %v729_v23, %v3912_v63  ;;  %v1261_v43 = vmin.f32 %v1229_v33, 6.0  ;;  %v3333_v33 = vld [vmem:[%s4864_s5 + $0x20] sm:$0xff] }
 0x16c   : > { %2158 = vmatpush.bf16.msrb.mxu0 %v3333_v33 }
 0x16d   : > { %v807_v35 = vmax.f32 %v651_v27, 0.0  ;;  %v800_v36 = vmax.f32 %v730_v31, 0.0  ;;  %v1388_v46 = vpack.c.bf16 %v1261_v43, %v1261_v43 }
 0x16e   : > { %v4036_v39 = vpop.f32.mrf.mxu2  ;;  %v1154_v40 = vpop.f32.mrf.mxu3 }
 0x16f   : > { %v871_v41 = vmin.f32 %v807_v35, 6.0  ;;  %v864_v42 = vmin.f32 %v800_v36, 6.0  ;;  %v1155_v44 = vadd.f32 %v1154_v40, %v1066_v37  ;;  %v4044_v4 = vunpack.c.l.b16 %v1388_v46  ;;  %v3342_v46 = vld [vmem:[%s4864_s5 + $0x68] sm:$0xff] }
 0x170   : > { %v1074_v36 = vadd.f32 %v3996_v29, %v4014_v12  ;;  %v3358_v12 = vld [vmem:[%s4864_s5 + $0xe8] sm:$0xff]  ;;  %2186 = vmatpush.bf16.msra.mxu1 %v3342_v46 }
 0x171   : > { %v909_v21 = vpack.c.bf16 %v871_v41, %v869_v34  ;;  %v906_v45 = vpack.c.bf16 %v864_v42, %v862_v32  ;;  %v1230_v28 = vmax.f32 %v1155_v44, 0.0  ;;  %2244 = vmatpush.bf16.msrb.mxu3 %v3358_v12 }
 0x172   : > { %v653_v47 = vpop.f32.mrf.mxu0  ;;  %v732_v49 = vpop.f32.mrf.mxu1 }
 0x173   : > { %1117 = vmatmul.bf16.gmra.mxu2 %v909_v21  ;;  %1196 = vmatmul.bf16.gmra.mxu3 %v906_v45  ;;  %v1262_v50 = vmin.f32 %v1230_v28, 6.0  ;;  %v654_v54 = vadd.f32 %v653_v47, %v3867_v3  ;;  %v733_v0 = vadd.f32 %v732_v49, %v3912_v63 }
 0x175   : > { %v1389_v57 = vpack.c.bf16 %v1262_v50, %v1262_v50  ;;  %v809_v55 = vmax.f32 %v654_v54, 0.0  ;;  %v802_v38 = vmax.f32 %v733_v0, 0.0  ;;  %v1076_v50 = vadd.f32 %v3996_v29, %v4036_v39 }
 0x176   : > { %v4041_v59 = vpop.f32.mrf.mxu2  ;;  %v1157_v60 = vpop.f32.mrf.mxu3 }
 0x177   : > { %v1158_v2 = vadd.f32 %v1157_v60, %v1069_v19  ;;  %v4046_v5 = vunpack.c.l.b16 %v1389_v57  ;;  %v873_v10 = vmin.f32 %v809_v55, 6.0  ;;  %v866_v9 = vmin.f32 %v802_v38, 6.0 }
 0x179   : > { %v1514_v7 = vpack.c.b16 %v4046_v5, %v4044_v4  ;;  %v1231_v61 = vmax.f32 %v1158_v2, 0.0  ;;  %v3555_v4 = vld [vmem:[%s4862_s3 + $0x70] sm:$0xff] }
 0x17a   : > { %v655_v6 = vpop.f32.mrf.mxu0  ;;  %v734_v52 = vpop.f32.mrf.mxu1 }
 0x17b   : > { %v656_v1 = vadd.f32 %v655_v6, %v3867_v3  ;;  %v735_v8 = vadd.f32 %v734_v52, %v3912_v63  ;;  %v1263_v22 = vmin.f32 %v1231_v61, 6.0  ;;  %v1079_v61 = vadd.f32 %v3996_v29, %v4041_v59 }
 0x17d   : > { %v811_v11 = vmax.f32 %v656_v1, 0.0  ;;  %v804_v13 = vmax.f32 %v735_v8, 0.0  ;;  %v1390_v34 = vpack.c.bf16 %v1263_v22, %v1263_v22 }
 0x17e   : > { %v4054_v15 = vpop.f32.mrf.mxu2  ;;  %v1159_v62 = vpop.f32.mrf.mxu3 }
 0x17f   : > { %v875_v17 = vmin.f32 %v811_v11, 6.0  ;;  %v868_v18 = vmin.f32 %v804_v13, 6.0  ;;  %v1160_v23 = vadd.f32 %v1159_v62, %v1071_v14  ;;  %v4067_v43 = vunpack.c.l.b16 %v1390_v34  ;;  %v3332_v34 = vld [vmem:[%s4864_s5 + $0x18] sm:$0xff] }
 0x180   : > { %v1081_v59 = vadd.f32 %v3996_v29, %v4054_v15  ;;  %v3349_v15 = vld [vmem:[%s4864_s5 + $0xa0] sm:$0xff]  ;;  %2159 = vmatpush.bf16.msrb.mxu0 %v3332_v34 }
 0x181   : > { %v911_v25 = vpack.c.bf16 %v875_v17, %v873_v10  ;;  %v908_v27 = vpack.c.bf16 %v868_v18, %v866_v9  ;;  %v1232_v3 = vmax.f32 %v1160_v23, 0.0  ;;  %2216 = vmatpush.bf16.msrb.mxu2 %v3349_v15 }
 0x182   : > { %v737_v31 = vpop.f32.mrf.mxu1 }
 0x183   : > { %1122 = vmatmul.bf16.gmra.mxu2 %v911_v25  ;;  %1201 = vmatmul.bf16.gmra.mxu3 %v908_v27  ;;  %v1264_v35 = vmin.f32 %v1232_v3, 6.0  ;;  %v738_v41 = vadd.f32 %v737_v31, %v3912_v63  ;;  %v3357_v31 = vld [vmem:[%s4864_s5 + $0xe0] sm:$0xff] }
 0x184   : > { %2245 = vmatpush.bf16.msrb.mxu3 %v3357_v31  ;;  %v3339_v31 = vld [vmem:[%s4864_s5 + $0x50] sm:$0xff] }
 0x185   : > { %v1391_v37 = vpack.c.bf16 %v1264_v35, %v1264_v35  ;;  %v806_v28 = vmax.f32 %v738_v41, 0.0 }
 0x186   : > { %v4064_v40 = vpop.f32.mrf.mxu2  ;;  %v1162_v32 = vpop.f32.mrf.mxu3 }
 0x187   : > { %v1163_v42 = vadd.f32 %v1162_v32, %v1074_v36  ;;  %v4069_v44 = vunpack.c.l.b16 %v1391_v37  ;;  %v870_v60 = vmin.f32 %v806_v28, 6.0  ;;  %v3356_v32 = vld [vmem:[%s4864_s5 + $0xd8] sm:$0xff] }
 0x188   : > { %2246 = vmatpush.bf16.msrb.mxu3 %v3356_v32  ;;  %v3338_v32 = vld [vmem:[%s4864_s5 + $0x48] sm:$0xff] }
 0x189   : > { %v1515_v45 = vpack.c.b16 %v4069_v44, %v4067_v43  ;;  %v1233_v47 = vmax.f32 %v1163_v42, 0.0  ;;  %v3558_v43 = vld [vmem:[%s4862_s3 + $0x58] sm:$0xff]  ;;  %v3559_v44 = vld [vmem:[%s4862_s3 + $0x50] sm:$0xff] }
 0x18a   : > { %v739_v21 = vpop.f32.mrf.mxu1 }
 0x18b   : > { %v740_v49 = vadd.f32 %v739_v21, %v3912_v63  ;;  %v1265_v0 = vmin.f32 %v1233_v47, 6.0  ;;  %v1084_v21 = vadd.f32 %v3996_v29, %v4064_v40  ;;  %v3341_v40 = vld [vmem:[%s4864_s5 + $0x60] sm:$0xff] }
 0x18c   : > { %2187 = vmatpush.bf16.msra.mxu1 %v3341_v40  ;;  %v3337_v40 = vld [vmem:[%s4864_s5 + $0x40] sm:$0xff] }
 0x18d   : > { %v808_v19 = vmax.f32 %v740_v49, 0.0  ;;  %v1392_v1 = vpack.c.bf16 %v1265_v0, %v1265_v0  ;;  %v3354_v0 = vld [vmem:[%s4864_s5 + $0xc8] sm:$0xff] }
 0x18e   : > { %v4082_v54 = vpop.f32.mrf.mxu2  ;;  %v1164_v57 = vpop.f32.mrf.mxu3 }
 0x18f   : > { %v872_v2 = vmin.f32 %v808_v19, 6.0  ;;  %v1165_v55 = vadd.f32 %v1164_v57, %v1076_v50  ;;  %v4091_v13 = vunpack.c.l.b16 %v1392_v1 }
 0x191   : > { %v1234_v6 = vmax.f32 %v1165_v55, 0.0  ;;  %v910_v52 = vpack.c.bf16 %v872_v2, %v870_v60 }
 0x192   : > { %v742_v38 = vpop.f32.mrf.mxu1 }
 0x193   : > { %v1266_v8 = vmin.f32 %v1234_v6, 6.0  ;;  %1127 = vmatmul.bf16.gmra.mxu2 %v913_v30  ;;  %1206 = vmatmul.bf16.gmra.mxu3 %v910_v52  ;;  %v743_v62 = vadd.f32 %v742_v38, %v3912_v63  ;;  %v1086_v6 = vadd.f32 %v3996_v29, %v4082_v54  ;;  %v3340_v54 = vld [vmem:[%s4864_s5 + $0x58] sm:$0xff] }
 0x194   : > { %2188 = vmatpush.bf16.msra.mxu1 %v3340_v54 }
 0x195   : > { %v1393_v39 = vpack.c.bf16 %v1266_v8, %v1266_v8  ;;  %v810_v26 = vmax.f32 %v743_v62, 0.0 }
 0x196   : > { %v4089_v10 = vpop.f32.mrf.mxu2  ;;  %v1167_v11 = vpop.f32.mrf.mxu3 }
 0x197   : > { %v4093_v14 = vunpack.c.l.b16 %v1393_v39  ;;  %v1168_v9 = vadd.f32 %v1167_v11, %v1079_v61  ;;  %v874_v27 = vmin.f32 %v810_v26, 6.0  ;;  %v3353_v39 = vld [vmem:[%s4864_s5 + $0xc0] sm:$0xff] }
 0x198   : > { %2189 = vmatpush.bf16.msra.mxu1 %v3339_v31 }
 0x199   : > { %v1516_v17 = vpack.c.b16 %v4093_v14, %v4091_v13  ;;  %v1235_v18 = vmax.f32 %v1168_v9, 0.0 }
 0x19a   : > { %v744_v24 = vpop.f32.mrf.mxu1 }
 0x19b   : > { %v745_v30 = vadd.f32 %v744_v24, %v3912_v63  ;;  %v4106_v33 = vmin.f32 %v1235_v18, 6.0  ;;  %v1089_v18 = vadd.f32 %v3996_v29, %v4089_v10 }
 0x19c   : > { %2190 = vmatpush.bf16.msra.mxu1 %v3338_v32 }
 0x19d   : > { %v812_v22 = vmax.f32 %v745_v30, 0.0  ;;  %v1394_v41 = vpack.c.bf16 %v4106_v33, %v4106_v33 }
 0x19e   : > { %v4101_v23 = vpop.f32.mrf.mxu2  ;;  %v1169_v25 = vpop.f32.mrf.mxu3 }
 0x19f   : > { %v876_v3 = vmin.f32 %v812_v22, 6.0  ;;  %v1170_v51 = vadd.f32 %v1169_v25, %v1081_v59  ;;  %v4134_v49 = vunpack.c.l.b16 %v1394_v41 }
 0x1a0   : > { %2191 = vmatpush.bf16.msra.mxu1 %v3337_v40 }
 0x1a1   : > { %v912_v35 = vpack.c.bf16 %v876_v3, %v874_v27  ;;  %v1236_v36 = vmax.f32 %v1170_v51, 0.0  ;;  %v3331_v3 = vld [vmem:[%s4864_s5 + $0x10] sm:$0xff] }
 0x1a2   : > { %v747_v37 = vpop.f32.mrf.mxu1  ;;  %2160 = vmatpush.bf16.msrb.mxu0 %v3331_v3 }
 0x1a3   : > { %1132 = vmatmul.bf16.gmra.mxu2 %v915_v58  ;;  %1211 = vmatmul.bf16.gmra.mxu3 %v912_v35  ;;  %v4122_v42 = vmin.f32 %v1236_v36, 6.0  ;;  %v748_v53 = vadd.f32 %v747_v37, %v3912_v63  ;;  %v3355_v58 = vld [vmem:[%s4864_s5 + $0xd0] sm:$0xff] }
 0x1a4   : > { %2247 = vmatpush.bf16.msrb.mxu3 %v3355_v58 }
 0x1a5   : > { %v1395_v28 = vpack.c.bf16 %v4122_v42, %v4122_v42  ;;  %v814_v57 = vmax.f32 %v748_v53, 0.0 }
 0x1a6   : > { %v4128_v47 = vpop.f32.mrf.mxu2  ;;  %v1172_v48 = vpop.f32.mrf.mxu3 }
 0x1a7   : > { %v4136_v12 = vunpack.c.l.b16 %v1395_v28  ;;  %v1173_v46 = vadd.f32 %v1172_v48, %v1084_v21  ;;  %v878_v1 = vmin.f32 %v814_v57, 6.0  ;;  %v1091_v28 = vadd.f32 %v3996_v29, %v4101_v23 }
 0x1a8   : > { %2248 = vmatpush.bf16.msrb.mxu3 %v3354_v0  ;;  %v1300_v23 = vrot.slane %v4122_v42, 7 }
 0x1a9   : > { %v1537_v50 = vpack.c.b16 %v4136_v12, %v4134_v49  ;;  %v1237_v2 = vmax.f32 %v1173_v46, 0.0  ;;  %v3365_v49 = vld [vmem:[%s4864_s5 + $0x120] sm:$0xff]  ;;  %v3383_v12 = vld [vmem:[%s4864_s5 + $0x1b0] sm:$0xff] }
 0x1aa   : > { %v749_v19 = vpop.f32.mrf.mxu1 }
 0x1ab   : > { %v750_v60 = vadd.f32 %v749_v19, %v3912_v63  ;;  %v4154_v61 = vmin.f32 %v1237_v2, 6.0  ;;  %v1299_v2 = vrot.slane %v4106_v33, 7 }
 0x1ac   : > { %2249 = vmatpush.bf16.msrb.mxu3 %v3353_v39 }
 0x1ad   : > { %v816_v55 = vmax.f32 %v750_v60, 0.0  ;;  %v1396_v26 = vpack.c.bf16 %v4154_v61, %v4154_v61  ;;  %v3348_v60 = vld [vmem:[%s4864_s5 + $0x98] sm:$0xff] }
 0x1ae   : > { %v4149_v52 = vpop.f32.mrf.mxu2  ;;  %v1174_v38 = vpop.f32.mrf.mxu3  ;;  %2217 = vmatpush.bf16.msrb.mxu2 %v3348_v60 }
 0x1af   : > { %v880_v8 = vmin.f32 %v816_v55, 6.0  ;;  %v1175_v11 = vadd.f32 %v1174_v38, %v1086_v6  ;;  %v4176_v51 = vunpack.c.l.b16 %v1396_v26  ;;  %v1094_v38 = vadd.f32 %v3996_v29, %v4128_v47 }
 0x1b1   : > { %v914_v62 = vpack.c.bf16 %v880_v8, %v878_v1  ;;  %v1238_v9 = vmax.f32 %v1175_v11, 0.0  ;;  %v1317_v1 = vsel %vm1315_vm1, 0.0, %v1300_v23  ;;  %v1316_v11 = vsel %vm1315_vm1, 0.0, %v1299_v2 }
 0x1b2   : > { %v752_v24 = vpop.f32.mrf.mxu1  ;;  %v1378_v47 = vpack.c.bf16 %v1316_v11, %v1316_v11 }
 0x1b3   : > { %1216 = vmatmul.bf16.gmra.mxu3 %v914_v62  ;;  %v4161_v30 = vmin.f32 %v1238_v9, 6.0  ;;  %v753_v27 = vadd.f32 %v752_v24, %v3912_v63  ;;  %v1379_v24 = vpack.c.bf16 %v1317_v1, %v1317_v1  ;;  %v3390_v1 = vld [vmem:[%s4864_s5 + $0x1e8] sm:$0xff] }
 0x1b5   : > { %v1397_v22 = vpack.c.bf16 %v4161_v30, %v4161_v30  ;;  %v818_v36 = vmax.f32 %v753_v27, 0.0  ;;  %v1481_v27 = vunpack.c.l.b16 %v1378_v47 }
 0x1b6   : > { %v4167_v59 = vpop.f32.mrf.mxu2  ;;  %v1177_v25 = vpop.f32.mrf.mxu3 }
 0x1b7   : > { %v4178_v34 = vunpack.c.l.b16 %v1397_v22  ;;  %v1178_v10 = vadd.f32 %v1177_v25, %v1089_v18  ;;  %v882_v58 = vmin.f32 %v818_v36, 6.0  ;;  %v1482_v18 = vunpack.c.l.b16 %v1379_v24 }
 0x1b8   : > { %v1096_v22 = vadd.f32 %v3996_v29, %v4149_v52  ;;  %v1302_v36 = vrot.slane %v4161_v30, 7  ;;  %v3392_v52 = vld [vmem:[%s4864_s5 + $0x1f8] sm:$0xff] }
 0x1b9   : > { %v1538_v35 = vpack.c.b16 %v4178_v34, %v4176_v51  ;;  %v1239_v41 = vmax.f32 %v1178_v10, 0.0  ;;  %2358 = vmatpush.bf16.msra.mxu3 %v3392_v52 }
 0x1ba   : > { %v754_v15 = vpop.f32.mrf.mxu1 }
 0x1bb   : > { %v755_v37 = vadd.f32 %v754_v15, %v3912_v63  ;;  %v4193_v63 = vmin.f32 %v1239_v41, 6.0  ;;  %v1489_v15 = vpack.c.b16 %v1482_v18, %v1481_v27  ;;  %v3389_v27 = vld [vmem:[%s4864_s5 + $0x1e0] sm:$0xff] }
 0x1bd   : > { %v820_v21 = vmax.f32 %v755_v37, 0.0  ;;  %v1398_v55 = vpack.c.bf16 %v4193_v63, %v4193_v63 }
 0x1be   : > { %v4188_v48 = vpop.f32.mrf.mxu2  ;;  %v1179_v53 = vpop.f32.mrf.mxu3 }
 0x1bf   : > { %v884_v46 = vmin.f32 %v820_v21, 6.0  ;;  %v1180_v19 = vadd.f32 %v1179_v53, %v1091_v28  ;;  %v4210_v62 = vunpack.c.l.b16 %v1398_v55  ;;  %v1301_v21 = vrot.slane %v4154_v61, 7  ;;  %v3330_v61 = vld [vmem:[%s4864_s5 + $0x8] sm:$0xff] }
 0x1c0   : > { %v1099_v28 = vadd.f32 %v3996_v29, %v4167_v59  ;;  %v3391_v59 = vld [vmem:[%s4864_s5 + $0x1f0] sm:$0xff]  ;;  %2161 = vmatpush.bf16.msrb.mxu0 %v3330_v61 }
 0x1c1   : > { %v916_v57 = vpack.c.bf16 %v884_v46, %v882_v58  ;;  %v1240_v0 = vmax.f32 %v1180_v19, 0.0  ;;  %v1319_v58 = vsel %vm1315_vm1, 0.0, %v1302_v36  ;;  %2359 = vmatpush.bf16.msra.mxu3 %v3391_v59  ;;  %v1303_v36 = vrot.slane %v4193_v63, 7  ;;  %v3387_v61 = vld [vmem:[%s4864_s5 + $0x1d0] sm:$0xff] }
 0x1c2   : > { %v1381_v23 = vpack.c.bf16 %v1319_v58, %v1319_v58 }
 0x1c3   : > { %1221 = vmatmul.bf16.gmra.mxu3 %v916_v57  ;;  %v4202_v6 = vmin.f32 %v1240_v0, 6.0  ;;  %v1318_v57 = vsel %vm1315_vm1, 0.0, %v1301_v21  ;;  %v3388_v21 = vld [vmem:[%s4864_s5 + $0x1d8] sm:$0xff]  ;;  %v1320_v58 = vsel %vm1315_vm1, 0.0, %v1303_v36 }
 0x1c4   : > { %v1380_v2 = vpack.c.bf16 %v1318_v57, %v1318_v57  ;;  %v1484_v24 = vunpack.c.l.b16 %v1381_v23  ;;  %v1382_v59 = vpack.c.bf16 %v1320_v58, %v1320_v58  ;;  %v3371_v58 = vld [vmem:[%s4864_s5 + $0x150] sm:$0xff] }
 0x1c5   : > { %v1399_v8 = vpack.c.bf16 %v4202_v6, %v4202_v6  ;;  %2360 = vmatpush.bf16.msra.mxu3 %v3390_v1 }
 0x1c6   : > { %v1182_v42 = vpop.f32.mrf.mxu3  ;;  %v4214_v9 = vpop.f32.mrf.mxu2 }
 0x1c7   : > { %v1183_v39 = vadd.f32 %v1182_v42, %v1094_v38  ;;  %v4212_v33 = vunpack.c.l.b16 %v1399_v8  ;;  %v1101_v8 = vadd.f32 %v3996_v29, %v4188_v48  ;;  %v1104_v52 = vadd.f32 %v3996_v29, %v4214_v9 }
 0x1c9   : > { %v1539_v54 = vpack.c.b16 %v4212_v33, %v4210_v62  ;;  %v1241_v26 = vmax.f32 %v1183_v39, 0.0  ;;  %v3627_v39 = vmov 0.0|0.0   ;;  %2361 = vmatpush.bf16.msra.mxu3 %v3389_v27 }
 0x1ca   : > { %v4258_v11 = vunpack.c.l.b16 %v3627_v39 }
 0x1cb   : > { %v4220_v3 = vmin.f32 %v1241_v26, 6.0 }
 0x1cd   : > { %v1400_v32 = vpack.c.bf16 %v4220_v3, %v4220_v3  ;;  %2362 = vmatpush.bf16.msra.mxu3 %v3388_v21  ;;  %v3372_v21 = vld [vmem:[%s4864_s5 + $0x158] sm:$0xff] }
 0x1ce   : > { %v1184_v25 = vpop.f32.mrf.mxu3  ;;  %v4223_v37 = vpop.f32.mrf.mxu2 }
 0x1cf   : > { %v1185_v31 = vadd.f32 %v1184_v25, %v1096_v22  ;;  %v4238_v46 = vunpack.c.l.b16 %v1400_v32  ;;  %v1483_v22 = vunpack.c.l.b16 %v1380_v2  ;;  %v3347_v25 = vld [vmem:[%s4864_s5 + $0x90] sm:$0xff]  ;;  %v3376_v32 = vld [vmem:[%s4864_s5 + $0x178] sm:$0xff]  ;;  %v3374_v2 = vld [vmem:[%s4864_s5 + $0x168] sm:$0xff]  ;;  %v1106_v1 = vadd.f32 %v3996_v29, %v4223_v37 }
 0x1d0   : > { %2218 = vmatpush.bf16.msrb.mxu2 %v3347_v25  ;;  %2300 = vmatpush.bf16.msrb.mxu1 %v3376_v32  ;;  %v3329_v25 = vld [vmem:[%s4864_s5] sm:$0xff]  ;;  %v1305_v32 = vrot.slane %v4220_v3, 7 }
 0x1d1   : > { %v1242_v10 = vmax.f32 %v1185_v31, 0.0  ;;  %v1490_v31 = vpack.c.b16 %v1484_v24, %v1483_v22  ;;  %2363 = vmatpush.bf16.msra.mxu3 %v3387_v61  ;;  %v1485_v22 = vunpack.c.l.b16 %v1382_v59  ;;  %v3373_v37 = vld [vmem:[%s4864_s5 + $0x160] sm:$0xff]  ;;  %2162 = vmatpush.bf16.msrb.mxu0 %v3329_v25 }
 0x1d2   : > { %v1322_v3 = vsel %vm1315_vm1, 0.0, %v1305_v32 }
 0x1d3   : > { %v4227_v41 = vmin.f32 %v1242_v10, 6.0  ;;  %2250 = vmatmul.bf16.vlgmr.msrb.gmra.mxu3 %v1489_v15  ;;  %v1304_v10 = vrot.slane %v4202_v6, 7 }
 0x1d5   : > { %v1401_v30 = vpack.c.bf16 %v4227_v41, %v4227_v41 }
 0x1d6   : > { %v1187_v53 = vpop.f32.mrf.mxu3  ;;  %v4251_v38 = vpop.f32.mrf.mxu2 }
 0x1d7   : > { %v4240_v40 = vunpack.c.l.b16 %v1401_v30  ;;  %v1188_v19 = vadd.f32 %v1187_v53, %v1099_v28  ;;  %v1321_v30 = vsel %vm1315_vm1, 0.0, %v1304_v10 }
 0x1d8   : > { %v1383_v57 = vpack.c.bf16 %v1321_v30, %v1321_v30 }
 0x1d9   : > { %v1243_v60 = vmax.f32 %v1188_v19, 0.0  ;;  %v1540_v0 = vpack.c.b16 %v4240_v40, %v4238_v46  ;;  %v3375_v19 = vld [vmem:[%s4864_s5 + $0x170] sm:$0xff]  ;;  %v3396_v40 = vld [vmem:[%s4864_s5 + $0x218] sm:$0xff] }
 0x1da   : > { %2301 = vmatpush.bf16.msrb.mxu1 %v3375_v19  ;;  %v3546_v19 = vld [vmem:[%s4862_s3 + $0x30] sm:$0xff] }
 0x1db   : > { %v1275_v55 = vmin.f32 %v1243_v60, 6.0 }
 0x1dd   : > { %v1364_v42 = vpack.c.bf16 %v1275_v55, %v1275_v55  ;;  %v3386_v55 = vld [vmem:[%s4864_s5 + $0x1c8] sm:$0xff] }
 0x1de   : > { %v1189_v47 = vpop.f32.mrf.mxu3  ;;  %v4280_v28 = vpop.f32.mrf.mxu2  ;;  %2302 = vmatpush.bf16.msrb.mxu1 %v3374_v2  ;;  %2364 = vmatpush.bf16.msra.mxu3 %v3386_v55  ;;  %v3370_v2 = vld [vmem:[%s4864_s5 + $0x148] sm:$0xff] }
 0x1df   : > { %v4260_v26 = vunpack.c.l.b16 %v1364_v42  ;;  %v1190_v18 = vadd.f32 %v1189_v47, %v1101_v8  ;;  %v1486_v42 = vunpack.c.l.b16 %v1383_v57  ;;  %v1384_v57 = vpack.c.bf16 %v1322_v3, %v1322_v3  ;;  %v3547_v55 = vld [vmem:[%s4862_s3 + $0x28] sm:$0xff] }
 0x1e1   : > { %v1443_v48 = vpack.c.b16 %v4260_v26, %v4258_v11  ;;  %v1244_v15 = vmax.f32 %v1190_v18, 0.0  ;;  %v1491_v10 = vpack.c.b16 %v1486_v42, %v1485_v22 }
 0x1e2   : > { %2303 = vmatpush.bf16.msrb.mxu1 %v3373_v37  ;;  %v1487_v37 = vunpack.c.l.b16 %v1384_v57 }
 0x1e3   : > { %2192 = vmatmul.bf16.vlgmr.msra.gmra.mxu1 %v1443_v48  ;;  %2255 = vmatmul.bf16.gmra.mxu3 %v1490_v31  ;;  %v1276_v53 = vmin.f32 %v1244_v15, 6.0  ;;  %v3385_v48 = vld [vmem:[%s4864_s5 + $0x1c0] sm:$0xff]  ;;  %v1306_v15 = vrot.slane %v4227_v41, 7 }
 0x1e4   : > { %2365 = vmatpush.bf16.msra.mxu3 %v3385_v48  ;;  %v3345_v48 = vld [vmem:[%s4864_s5 + $0x80] sm:$0xff] }
 0x1e5   : > { %v1365_v60 = vpack.c.bf16 %v1276_v53, %v1276_v53  ;;  %v1323_v30 = vsel %vm1315_vm1, 0.0, %v1306_v15 }
 0x1e6   : > { %v1192_v6 = vpop.f32.mrf.mxu3  ;;  %v1113_v27 = vpop.f32.mrf.mxu2  ;;  %2304 = vmatpush.bf16.msrb.mxu1 %v3372_v21  ;;  %v3549_v21 = vld [vmem:[%s4862_s3 + $0x18] sm:$0xff] }
 0x1e7   : > { %v1193_v63 = vadd.f32 %v1192_v6, %v1104_v52  ;;  %v4298_v24 = vunpack.c.l.b16 %v1365_v60  ;;  %v3545_v52 = vld [vmem:[%s4862_s3 + $0x38] sm:$0xff]  ;;  %v1109_v6 = vadd.f32 %v3996_v29, %v4251_v38 }
 0x1e8   : > { %2652 = vmatpush.bf16.msrb.mxu3 %v3545_v52  ;;  %v1114_v52 = vadd.f32 %v3996_v29, %v1113_v27 }
 0x1e9   : > { %v1245_v9 = vmax.f32 %v1193_v63, 0.0 }
 0x1ea   : > { %2305 = vmatpush.bf16.msrb.mxu1 %v3371_v58 }
 0x1eb   : > { %v1277_v23 = vmin.f32 %v1245_v9, 6.0  ;;  %v1385_v9 = vpack.c.bf16 %v1323_v30, %v1323_v30 }
 0x1ec   : > { %2653 = vmatpush.bf16.msrb.mxu3 %v3546_v19  ;;  %v3551_v19 = vld [vmem:[%s4862_s3 + $0x8] sm:$0xff] }
 0x1ed   : > { %v1366_v8 = vpack.c.bf16 %v1277_v23, %v1277_v23  ;;  %v3346_v23 = vld [vmem:[%s4864_s5 + $0x88] sm:$0xff]  ;;  %v1488_v42 = vunpack.c.l.b16 %v1385_v9 }
 0x1ee   : > { %v1194_v39 = vpop.f32.mrf.mxu3  ;;  %v4331_v38 = vpop.f32.mrf.mxu2  ;;  %2219 = vmatpush.bf16.msrb.mxu2 %v3346_v23  ;;  %2306 = vmatpush.bf16.msrb.mxu1 %v3370_v2  ;;  %v3552_v23 = vld [vmem:[%s4862_s3] sm:$0xff]  ;;  %v1557_v2 = vpack.c.b16 %v4298_v24, %v4260_v26 }
 0x1ef   : > { %v4300_v47 = vunpack.c.l.b16 %v1366_v8  ;;  %v1195_v18 = vadd.f32 %v1194_v39, %v1106_v1  ;;  %v1111_v1 = vadd.f32 %v3996_v29, %v4280_v28  ;;  %v3548_v28 = vld [vmem:[%s4862_s3 + $0x20] sm:$0xff]  ;;  %v1492_v15 = vpack.c.b16 %v1488_v42, %v1487_v37 }
 0x1f0   : > { %2654 = vmatpush.bf16.msrb.mxu3 %v3547_v55 }
 0x1f1   : > { %v1444_v31 = vpack.c.b16 %v4300_v47, %v4298_v24  ;;  %v1246_v36 = vmax.f32 %v1195_v18, 0.0 }
 0x1f2   : > { %2220 = vmatpush.bf16.msrb.mxu2 %v3345_v48 }
 0x1f3   : > { %2197 = vmatmul.bf16.gmra.mxu1 %v1444_v31  ;;  %2260 = vmatmul.bf16.gmra.mxu3 %v1491_v10  ;;  %v1278_v53 = vmin.f32 %v1246_v36, 6.0  ;;  %v3369_v31 = vld [vmem:[%s4864_s5 + $0x140] sm:$0xff] }
 0x1f4   : > { %2655 = vmatpush.bf16.msrb.mxu3 %v3548_v28  ;;  %2307 = vmatpush.bf16.msrb.mxu1 %v3369_v31 }
 0x1f5   : > { %v1367_v59 = vpack.c.bf16 %v1278_v53, %v1278_v53  ;;  %v3550_v53 = vld [vmem:[%s4862_s3 + $0x10] sm:$0xff] }
 0x1f6   : > { %v1197_v41 = vpop.f32.mrf.mxu3  ;;  %v1118_v32 = vpop.f32.mrf.mxu2 }
 0x1f7   : > { %v1198_v63 = vadd.f32 %v1197_v41, %v1109_v6  ;;  %v4344_v18 = vunpack.c.l.b16 %v1367_v59 }
 0x1f8   : > { %2656 = vmatpush.bf16.msrb.mxu3 %v3549_v21  ;;  %v3366_v21 = vld [vmem:[%s4864_s5 + $0x128] sm:$0xff] }
 0x1f9   : > { %v1247_v61 = vmax.f32 %v1198_v63, 0.0 }
 0x1fb   : > { %v1279_v60 = vmin.f32 %v1247_v61, 6.0 }
 0x1fc   : > { %2657 = vmatpush.bf16.msrb.mxu3 %v3550_v53  ;;  %v1558_v53 = vpack.c.b16 %v4344_v18, %v4300_v47 }
 0x1fd   : > { %v1368_v8 = vpack.c.bf16 %v1279_v60, %v1279_v60  ;;  %v3368_v60 = vld [vmem:[%s4864_s5 + $0x138] sm:$0xff] }
 0x1fe   : > { %v1199_v39 = vpop.f32.mrf.mxu3  ;;  %v1120_v9 = vpop.f32.mrf.mxu2  ;;  %2271 = vmatpush.bf16.msra.mxu0 %v3368_v60 }
 0x1ff   : > { %v4346_v22 = vunpack.c.l.b16 %v1368_v8  ;;  %v1200_v25 = vadd.f32 %v1199_v39, %v1111_v1  ;;  %v1119_v1 = vadd.f32 %v3996_v29, %v1118_v32  ;;  %v3367_v39 = vld [vmem:[%s4864_s5 + $0x130] sm:$0xff]  ;;  %v1121_v26 = vadd.f32 %v3996_v29, %v1120_v9 }
 0x200   : > { %2658 = vmatpush.bf16.msrb.mxu3 %v3551_v19 }
 0x201   : > { %v1445_v10 = vpack.c.b16 %v4346_v22, %v4344_v18  ;;  %v1248_v36 = vmax.f32 %v1200_v25, 0.0 }
 0x202   : > { %2272 = vmatpush.bf16.msra.mxu0 %v3367_v39 }
 0x203   : > { %2202 = vmatmul.bf16.gmra.mxu1 %v1445_v10  ;;  %2265 = vmatmul.bf16.gmra.mxu3 %v1492_v15  ;;  %v1280_v41 = vmin.f32 %v1248_v36, 6.0 }
 0x204   : > { %2659 = vmatpush.bf16.msrb.mxu3 %v3552_v23 }
 0x205   : > { %v1369_v3 = vpack.c.bf16 %v1280_v41, %v1280_v41 }
 0x206   : > { %v1202_v6 = vpop.f32.mrf.mxu3  ;;  %v1123_v25 = vpop.f32.mrf.mxu2  ;;  %2273 = vmatpush.bf16.msra.mxu0 %v3366_v21 }
 0x207   : > { %v1203_v30 = vadd.f32 %v1202_v6, %v1114_v52  ;;  %v4369_v27 = vunpack.c.l.b16 %v1369_v3  ;;  %v1124_v19 = vadd.f32 %v3996_v29, %v1123_v25 }
 0x209   : > { %v1249_v63 = vmax.f32 %v1203_v30, 0.0  ;;  %v1559_v21 = vpack.c.b16 %v4369_v27, %v4346_v22  ;;  %v3380_v22 = vld [vmem:[%s4864_s5 + $0x198] sm:$0xff] }
 0x20a   : > { %2274 = vmatpush.bf16.msra.mxu0 %v3365_v49  ;;  %v3362_v49 = vld [vmem:[%s4864_s5 + $0x108] sm:$0xff] }
 0x20b   : > { %v1281_v58 = vmin.f32 %v1249_v63, 6.0 }
 0x20d   : > { %v1370_v61 = vpack.c.bf16 %v1281_v58, %v1281_v58  ;;  %v3384_v58 = vld [vmem:[%s4864_s5 + $0x1b8] sm:$0xff] }
 0x20e   : > { %v1204_v57 = vpop.f32.mrf.mxu3  ;;  %v1125_v41 = vpop.f32.mrf.mxu2  ;;  %2329 = vmatpush.bf16.msra.mxu2 %v3384_v58 }
 0x20f   : > { %v4371_v59 = vunpack.c.l.b16 %v1370_v61 }
 0x211   : > { %v1446_v55 = vpack.c.b16 %v4371_v59, %v4369_v27  ;;  %v4454_v27 = vld [vmem:[%s4863_s4] ss:$0 sm:$0xff] }
 0x212   : > { %2330 = vmatpush.bf16.msra.mxu2 %v3383_v12 }
 0x213   : > { %2207 = vmatmul.bf16.gmra.mxu1 %v1446_v55  ;;  %2366 = vmatmul.bf16.vlgmr.msra.gmra.mxu3 %v1557_v2  ;;  %v1116_v55 = vadd.f32 %v3996_v29, %v4331_v38  ;;  %v3364_v38 = vld [vmem:[%s4864_s5 + $0x118] sm:$0xff] }
 0x214   : > { %2275 = vmatpush.bf16.msra.mxu0 %v3364_v38 }
 0x216   : > { %v1207_v8 = vpop.f32.mrf.mxu3 }
 0x217   : > { %v1208_v42 = vadd.f32 %v1207_v8, %v1119_v1  ;;  %v1128_v1 = vpop.f32.mrf.mxu2  ;;  %v3382_v8 = vld [vmem:[%s4864_s5 + $0x1a8] sm:$0xff] }
 0x218   : > { %2331 = vmatpush.bf16.msra.mxu2 %v3382_v8 }
 0x219   : > { %v1251_v37 = vmax.f32 %v1208_v42, 0.0  ;;  %v1126_v42 = vadd.f32 %v3996_v29, %v1125_v41  ;;  %v3381_v29 = vld [vmem:[%s4864_s5 + $0x1a0] sm:$0xff] }
 0x21b   : > { %v1283_v48 = vmin.f32 %v1251_v37, 6.0  ;;  %v1205_v37 = vadd.f32 %v1204_v57, %v1116_v55 }
 0x21c   : > { %2332 = vmatpush.bf16.msra.mxu2 %v3381_v29  ;;  %v3377_v29 = vld [vmem:[%s4864_s5 + $0x180] sm:$0xff] }
 0x21d   : > { %v1332_v24 = vrot.slane %v1283_v48, 7  ;;  %v1371_v31 = vpack.c.bf16 %v1283_v48, %v1283_v48 }
 0x21e   : > { %v1209_v28 = vpop.f32.mrf.mxu3 }
 0x21f   : > { %v1348_v10 = vsel %vm1315_vm1, 0.0, %v1332_v24  ;;  %v4389_v15 = vunpack.c.l.b16 %v1371_v31  ;;  %v1210_v36 = vadd.f32 %v1209_v28, %v1121_v26 }
 0x220   : > { %v1357_v32 = vpack.c.bf16 %v1348_v10, %v1348_v10  ;;  %2333 = vmatpush.bf16.msra.mxu2 %v3380_v22 }
 0x221   : > { %v1465_v52 = vpack.c.b16 %v4389_v15, %v4258_v11  ;;  %v1252_v6 = vmax.f32 %v1210_v36, 0.0 }
 0x222   : > { %v4396_v30 = vunpack.c.l.b16 %v1357_v32  ;;  %v1250_v32 = vmax.f32 %v1205_v37, 0.0 }
 0x223   : > { %v1284_v63 = vmin.f32 %v1252_v6, 6.0  ;;  %2221 = vmatmul.bf16.vlgmr.msrb.gmra.mxu2 %v1465_v52  ;;  %2308 = vmatmul.bf16.vlgmr.msrb.gmra.mxu1 %v1537_v50 }
 0x224   : > { %2371 = vmatmul.bf16.gmra.mxu3 %v1558_v53  ;;  %v1421_v3 = vpack.c.b16 %v4396_v30, %v4258_v11  ;;  %v1282_v58 = vmin.f32 %v1250_v32, 6.0 }
 0x225   : > { %v1372_v61 = vpack.c.bf16 %v1284_v63, %v1284_v63  ;;  %v1333_v47 = vrot.slane %v1284_v63, 7  ;;  %v1129_v63 = vadd.f32 %v4454_v27, %v1128_v1 }
 0x226   : > { %v1212_v9 = vpop.f32.mrf.mxu3  ;;  %2163 = vmatmul.bf16.vlgmr.msrb.gmra.mxu0 %v1421_v3 }
 0x227   : > { %v4409_v18 = vunpack.c.l.b16 %v1372_v61  ;;  %v1213_v60 = vadd.f32 %v1212_v9, %v1124_v19  ;;  %v1349_v2 = vsel %vm1315_vm1, 0.0, %v1333_v47  ;;  %v1130_v19 = vpop.f32.mrf.mxu2  ;;  %v3363_v9 = vld [vmem:[%s4864_s5 + $0x110] sm:$0xff] }
 0x228   : > { %v1358_v26 = vpack.c.bf16 %v1349_v2, %v1349_v2  ;;  %v3379_v47 = vld [vmem:[%s4864_s5 + $0x190] sm:$0xff]  ;;  %2276 = vmatpush.bf16.msra.mxu0 %v3363_v9  ;;  %v1131_v1 = vadd.f32 %v4454_v27, %v1130_v19 }
 0x229   : > { %v1567_v50 = vpack.c.b16 %v4409_v18, %v4389_v15  ;;  %v1253_v11 = vmax.f32 %v1213_v60, 0.0  ;;  %2334 = vmatpush.bf16.msra.mxu2 %v3379_v47 }
 0x22a   : > { %v4439_v52 = vunpack.c.l.b16 %v1358_v26 }
 0x22b   : > { %v1285_v23 = vmin.f32 %v1253_v11, 6.0  ;;  %v1403_v11 = vpack.c.bf16 %v1282_v58, %v1282_v58 }
 0x22c   : > { %2277 = vmatpush.bf16.msra.mxu0 %v3362_v49  ;;  %v1547_v46 = vpack.c.b16 %v4439_v52, %v4396_v30  ;;  %v3554_v30 = vld [vmem:[%s4862_s3 + $0x78] sm:$0xff] }
 0x22d   : > { %v1334_v39 = vrot.slane %v1285_v23, 7  ;;  %v1373_v25 = vpack.c.bf16 %v1285_v23, %v1285_v23  ;;  %v3378_v23 = vld [vmem:[%s4864_s5 + $0x188] sm:$0xff] }
 0x22e   : > { %v1214_v48 = vpop.f32.mrf.mxu3  ;;  %2335 = vmatpush.bf16.msra.mxu2 %v3378_v23 }
 0x22f   : > { %v1350_v24 = vsel %vm1315_vm1, 0.0, %v1334_v39  ;;  %v4427_v31 = vunpack.c.l.b16 %v1373_v25  ;;  %v1215_v28 = vadd.f32 %v1214_v48, %v1126_v42  ;;  %v1556_v39 = vunpack.c.l.b16 %v1403_v11  ;;  %v3361_v48 = vld [vmem:[%s4864_s5 + $0x100] sm:$0xff] }
 0x230   : > { %v1359_v10 = vpack.c.bf16 %v1350_v24, %v1350_v24  ;;  %2278 = vmatpush.bf16.msra.mxu0 %v3361_v48 }
 0x231   : > { %v1254_v36 = vmax.f32 %v1215_v28, 0.0  ;;  %v1466_v57 = vpack.c.b16 %v4427_v31, %v4409_v18  ;;  %v1560_v32 = vpack.c.b16 %v1556_v39, %v4371_v59  ;;  %v3400_v59 = vld [vmem:[%s4864_s5 + $0x238] sm:$0xff] }
 0x232   : > { %v4441_v6 = vunpack.c.l.b16 %v1359_v10  ;;  %v1133_v10 = vpop.f32.mrf.mxu2  ;;  %2336 = vmatpush.bf16.msra.mxu2 %v3377_v29 }
 0x233   : > { %v1286_v41 = vmin.f32 %v1254_v36, 6.0  ;;  %2226 = vmatmul.bf16.gmra.mxu2 %v1466_v57  ;;  %2313 = vmatmul.bf16.gmra.mxu1 %v1538_v35 }
 0x234   : > { %2376 = vmatmul.bf16.gmra.mxu3 %v1559_v21  ;;  %v1422_v53 = vpack.c.b16 %v4441_v6, %v4439_v52  ;;  %2387 = vmatpush.bf16.msrb.mxu0 %v3400_v59 }
 0x235   : > { %v1374_v3 = vpack.c.bf16 %v1286_v41, %v1286_v41  ;;  %v1335_v34 = vrot.slane %v1286_v41, 7 }
 0x236   : > { %v1217_v51 = vpop.f32.mrf.mxu3  ;;  %2168 = vmatmul.bf16.gmra.mxu0 %v1422_v53 }
 0x237   : > { %v4457_v35 = vunpack.c.l.b16 %v1374_v3  ;;  %v1218_v61 = vadd.f32 %v1217_v51, %v1129_v63  ;;  %v1351_v55 = vsel %vm1315_vm1, 0.0, %v1335_v34  ;;  %v1134_v63 = vadd.f32 %v4454_v27, %v1133_v10 }
 0x238   : > { %v1360_v37 = vpack.c.bf16 %v1351_v55, %v1351_v55 }
 0x239   : > { %v1255_v60 = vmax.f32 %v1218_v61, 0.0  ;;  %v1568_v12 = vpack.c.b16 %v4457_v35, %v4427_v31 }
 0x23a   : > { %v1417_v21 = vunpack.c.l.b16 %v1360_v37  ;;  %v1135_v33 = vpop.f32.mrf.mxu2 }
 0x23b   : > { %v1287_v2 = vmin.f32 %v1255_v60, 6.0  ;;  %v1136_v47 = vadd.f32 %v4454_v27, %v1135_v33 }
 0x23d   : > { %v1336_v8 = vrot.slane %v1287_v2, 7  ;;  %v1375_v42 = vpack.c.bf16 %v1287_v2, %v1287_v2  ;;  %v3399_v2 = vld [vmem:[%s4864_s5 + $0x230] sm:$0xff] }
 0x23e   : > { %v1219_v25 = vpop.f32.mrf.mxu3  ;;  %2388 = vmatpush.bf16.msrb.mxu0 %v3399_v2 }
 0x23f   : > { %v1352_v26 = vsel %vm1315_vm1, 0.0, %v1336_v8  ;;  %v4479_v24 = vunpack.c.l.b16 %v1375_v42  ;;  %v1220_v28 = vadd.f32 %v1219_v25, %v1131_v1 }
 0x240   : > { %v1361_v38 = vpack.c.bf16 %v1352_v26, %v1352_v26 }
 0x241   : > { %v1256_v36 = vmax.f32 %v1220_v28, 0.0  ;;  %v1467_v57 = vpack.c.b16 %v4479_v24, %v4457_v35 }
 0x242   : > { %v4487_v41 = vunpack.c.l.b16 %v1361_v38  ;;  %v3398_v38 = vld [vmem:[%s4864_s5 + $0x228] sm:$0xff] }
 0x243   : > { %v1288_v53 = vmin.f32 %v1256_v36, 6.0  ;;  %2231 = vmatmul.bf16.gmra.mxu2 %v1467_v57  ;;  %2318 = vmatmul.bf16.gmra.mxu1 %v1539_v54  ;;  %v3397_v57 = vld [vmem:[%s4864_s5 + $0x220] sm:$0xff] }
 0x244   : > { %2381 = vmatmul.bf16.gmra.mxu3 %v1560_v32  ;;  %v1423_v22 = vpack.c.b16 %v4487_v41, %v1417_v21  ;;  %2389 = vmatpush.bf16.msrb.mxu0 %v3398_v38  ;;  %v1548_v32 = vpack.c.b16 %v1417_v21, %v4441_v6  ;;  %v3556_v6 = vld [vmem:[%s4862_s3 + $0x68] sm:$0xff] }
 0x245   : > { %v1376_v3 = vpack.c.bf16 %v1288_v53, %v1288_v53  ;;  %v1337_v19 = vrot.slane %v1288_v53, 7 }
 0x246   : > { %v1222_v58 = vpop.f32.mrf.mxu3  ;;  %2173 = vmatmul.bf16.gmra.mxu0 %v1423_v22  ;;  %v3560_v22 = vld [vmem:[%s4862_s3 + $0x48] sm:$0xff] }
 0x247   : > { %v4497_v51 = vunpack.c.l.b16 %v1376_v3  ;;  %v1223_v34 = vadd.f32 %v1222_v58, %v1134_v63  ;;  %v1353_v9 = vsel %vm1315_vm1, 0.0, %v1337_v19  ;;  %v3561_v3 = vld [vmem:[%s4862_s3 + $0x40] sm:$0xff] }
 0x248   : > { %v1362_v23 = vpack.c.bf16 %v1353_v9, %v1353_v9  ;;  %2390 = vmatpush.bf16.msrb.mxu0 %v3397_v57  ;;  %v4580_v58 = vld [vmem:[%s4865_s6] ss:$0 sm:$0xff] }
 0x249   : > { %v1257_v61 = vmax.f32 %v1223_v34, 0.0  ;;  %v1569_v62 = vpack.c.b16 %v4497_v51, %v4479_v24  ;;  %v3416_v24 = vld [vmem:[%s4866_s7 + $0x74] sm:$0xf0] }
 0x24a   : > { %v1419_v37 = vunpack.c.l.b16 %v1362_v23 }
 0x24b   : > { %v1289_v54 = vmin.f32 %v1257_v61, 6.0 }
 0x24c   : > { %2391 = vmatpush.bf16.msrb.mxu0 %v3396_v40 }
 0x24d   : > { %v1338_v60 = vrot.slane %v1289_v54, 7  ;;  %v1377_v49 = vpack.c.bf16 %v1289_v54, %v1289_v54 }
 0x24e   : > { %v1224_v11 = vpop.f32.mrf.mxu3 }
 0x24f   : > { %v1354_v55 = vsel %vm1315_vm1, 0.0, %v1338_v60  ;;  %v4507_v1 = vunpack.c.l.b16 %v1377_v49  ;;  %v1225_v8 = vadd.f32 %v1224_v11, %v1136_v47 }
 0x250   : > { %v1363_v42 = vpack.c.bf16 %v1354_v55, %v1354_v55 }
 0x251   : > { %v1258_v39 = vmax.f32 %v1225_v8, 0.0  ;;  %v1468_v25 = vpack.c.b16 %v4507_v1, %v4497_v51 }
 0x252   : > { %v1420_v48 = vunpack.c.l.b16 %v1363_v42 }
 0x253   : > { %v1290_v26 = vmin.f32 %v1258_v39, 6.0  ;;  %2236 = vmatmul.bf16.gmra.mxu2 %v1468_v25  ;;  %2323 = vmatmul.bf16.gmra.mxu1 %v1540_v0  ;;  %v3395_v0 = vld [vmem:[%s4864_s5 + $0x210] sm:$0xff] }
 0x254   : > { %v1424_v28 = vpack.c.b16 %v1420_v48, %v1419_v37  ;;  %2392 = vmatpush.bf16.msrb.mxu0 %v3395_v0  ;;  %v3293_v0 = vld [vmem:[%s4866_s7 + $0x70] sm:$0xf] }
 0x255   : > { %v1404_v10 = vpack.c.bf16 %v1290_v26, %v1290_v26  ;;  %v1339_v52 = vrot.slane %v1290_v26, 7 }
 0x256   : > { %2178 = vmatmul.bf16.gmra.mxu0 %v1424_v28  ;;  %v2251_v63 = vpop.f32.mrf.mxu3 }
 0x257   : > { %v4517_v29 = vunpack.c.l.b16 %v1404_v10  ;;  %v1355_v5 = vsel %vm1315_vm1, 0.0, %v1339_v52 }
 0x258   : > { %2393 = vmatpush.bf16.msrb.mxu0 %v3394_v16 }
 0x259   : > { %v1570_v36 = vpack.c.b16 %v4517_v29, %v4507_v1  ;;  %v3285_v1 = vld [vmem:[%s4866_s7 + $0x60] sm:$0xf]  ;;  %v3414_v29 = vld [vmem:[%s4866_s7 + $0x64] sm:$0xf0] }
 0x25c   : > { %2394 = vmatpush.bf16.msrb.mxu0 %v3393_v56 }
 0x25e   : > { %v4588_v34 = vpop.f32.mrf.mxu3 }
 0x263   : > { %2337 = vmatmul.bf16.vlgmr.msra.gmra.mxu2 %v1547_v46 }
 0x266   : > { %2279 = vmatmul.bf16.vlgmr.msra.gmra.mxu0 %v1513_v20  ;;  %v1549_v20 = vpack.c.b16 %v1419_v37, %v4487_v41  ;;  %v3557_v41 = vld [vmem:[%s4862_s3 + $0x60] sm:$0xff]  ;;  %v2256_v60 = vpop.f32.mrf.mxu3 }
 0x267   : > { %2681 = vmatpush.bf16.msra.mxu0 %v3554_v30  ;;  %v3295_v30 = vld [vmem:[%s4866_s7 + $0x78] sm:$0xf0] }
 0x26b   : > { %2682 = vmatpush.bf16.msra.mxu0 %v3555_v4 }
 0x26e   : > { %v4602_v55 = vpop.f32.mrf.mxu3 }
 0x26f   : > { %2683 = vmatpush.bf16.msra.mxu0 %v3556_v6  ;;  %v3413_v6 = vld [vmem:[%s4866_s7 + $0x64] sm:$0xf] }
 0x273   : > { %2342 = vmatmul.bf16.gmra.mxu2 %v1548_v32  ;;  %2684 = vmatpush.bf16.msra.mxu0 %v3557_v41 }
 0x276   : > { %2284 = vmatmul.bf16.gmra.mxu0 %v1514_v7  ;;  %v1402_v7 = vpack.c.bf16 %v1355_v5, %v1355_v5 }
 0x277   : > { %2685 = vmatpush.bf16.msra.mxu0 %v3558_v43 }
 0x278   : > { %v1546_v21 = vunpack.c.l.b16 %v1402_v7 }
 0x27a   : > { %v1550_v53 = vpack.c.b16 %v1546_v21, %v1420_v48  ;;  %v2261_v48 = vpop.f32.mrf.mxu3  ;;  %v3287_v21 = vld [vmem:[%s4866_s7 + $0x68] sm:$0xf0] }
 0x27b   : > { %2686 = vmatpush.bf16.msra.mxu0 %v3559_v44  ;;  %v3290_v41 = vor.u32 %v3413_v6, %v3287_v21  ;;  %v3277_v44 = vld [vmem:[%s4866_s7 + $0x50] sm:$0xf]  ;;  %v3237_v6 = vld [vmem:[%s4866_s7] sm:$0xf]  ;;  %v3402_v21 = vld [vmem:[%s4866_s7 + $0x4] sm:$0xf0] }
 0x27f   : > { %2687 = vmatpush.bf16.msra.mxu0 %v3560_v22 }
 0x282   : > { %v4620_v57 = vpop.f32.mrf.mxu3 }
 0x283   : > { %2347 = vmatmul.bf16.gmra.mxu2 %v1549_v20  ;;  %2688 = vmatpush.bf16.msra.mxu0 %v3561_v3  ;;  %v3415_v20 = vld [vmem:[%s4866_s7 + $0x74] sm:$0xf]  ;;  %v3279_v3 = vld [vmem:[%s4866_s7 + $0x58] sm:$0xf0] }
 0x284   : > { %v3298_v4 = vor.u32 %v3415_v20, %v3295_v30 }
 0x286   : > { %2289 = vmatmul.bf16.gmra.mxu0 %v1515_v45  ;;  %v2193_v45 = vpop.f32.mrf.mxu1  ;;  %2567 = vmatpush.bf16.msrb.mxu2 %v3298_v4 }
 0x28a   : > { %v2266_v52 = vpop.f32.mrf.mxu3  ;;  %2568 = vmatpush.bf16.msrb.mxu2 %v3290_v41  ;;  %v3401_v41 = vld [vmem:[%s4866_s7 + $0x4] sm:$0xf] }
 0x28e   : > { %v4582_v59 = vpop.f32.mrf.mxu1 }
 0x292   : > { %v4727_v20 = vpop.f32.mrf.mxu3 }
 0x293   : > { %2352 = vmatmul.bf16.gmra.mxu2 %v1550_v53 }
 0x296   : > { %2294 = vmatmul.bf16.gmra.mxu0 %v1516_v17  ;;  %v2198_v9 = vpop.f32.mrf.mxu1 }
 0x29e   : > { %v4598_v15 = vpop.f32.mrf.mxu1 }
 0x2a3   : > { %v2164_v13 = vpop.f32.mrf.mxu0 }
 0x2a4   : > { %v2165_v14 = vadd.f32 %v4580_v58, %v2164_v13 }
 0x2a6   : > { %v2194_v17 = vadd.f32 %v2193_v45, %v2165_v14  ;;  %v2222_v19 = vpop.f32.mrf.mxu2  ;;  %2395 = vmatmul.bf16.vlgmr.msrb.gmra.mxu0 %v1567_v50  ;;  %v2203_v39 = vpop.f32.mrf.mxu1  ;;  %v3412_v45 = vld [vmem:[%s4866_s7 + $0x54] sm:$0xf0] }
 0x2a7   : > { %v3278_v22 = vor.u32 %v3412_v45, %v3277_v44  ;;  %v3239_v44 = vld [vmem:[%s4866_s7 + $0x8] sm:$0xf0] }
 0x2a8   : > { %v2223_v61 = vadd.f32 %v2222_v19, %v2194_v17  ;;  %v3269_v17 = vld [vmem:[%s4866_s7 + $0x40] sm:$0xf]  ;;  %v3410_v19 = vld [vmem:[%s4866_s7 + $0x44] sm:$0xf0]  ;;  %v3242_v45 = vor.u32 %v3401_v41, %v3239_v44 }
 0x2aa   : > { %v2252_v33 = vadd.f32 %v2251_v63, %v2223_v61  ;;  %v3411_v63 = vld [vmem:[%s4866_s7 + $0x54] sm:$0xf]  ;;  %v3270_v61 = vor.u32 %v3410_v19, %v3269_v17 }
 0x2ab   : > { %v4590_v54 = vpop.f32.mrf.mxu0  ;;  %v3282_v13 = vor.u32 %v3411_v63, %v3279_v3 }
 0x2ad   : > { %2569 = vmatpush.bf16.msrb.mxu2 %v3282_v13 }
 0x2ae   : > { %v4592_v47 = vpop.f32.mrf.mxu2 }
 0x2b3   : > { %v2169_v49 = vpop.f32.mrf.mxu0 }
 0x2b4   : > { %v2170_v11 = vadd.f32 %v4580_v58, %v2169_v49 }
 0x2b6   : > { %v2199_v23 = vadd.f32 %v2198_v9, %v2170_v11  ;;  %v2227_v2 = vpop.f32.mrf.mxu2  ;;  %2400 = vmatmul.bf16.gmra.mxu0 %v1568_v12  ;;  %v4614_v12 = vpop.f32.mrf.mxu1  ;;  %v3271_v9 = vld [vmem:[%s4866_s7 + $0x48] sm:$0xf0] }
 0x2b8   : > { %v2228_v18 = vadd.f32 %v2227_v2, %v2199_v23  ;;  %v3261_v23 = vld [vmem:[%s4866_s7 + $0x30] sm:$0xf]  ;;  %v3408_v2 = vld [vmem:[%s4866_s7 + $0x34] sm:$0xf0] }
 0x2ba   : > { %v4600_v50 = vadd.f32 %v2256_v60, %v2228_v18  ;;  %v3262_v18 = vor.u32 %v3408_v2, %v3261_v23 }
 0x2bb   : > { %v4604_v8 = vpop.f32.mrf.mxu0 }
 0x2be   : > { %v4606_v42 = vpop.f32.mrf.mxu2  ;;  %v2208_v51 = vpop.f32.mrf.mxu1 }
 0x2c3   : > { %v2174_v25 = vpop.f32.mrf.mxu0 }
 0x2c4   : > { %v2175_v37 = vadd.f32 %v4580_v58, %v2174_v25  ;;  %v3263_v25 = vld [vmem:[%s4866_s7 + $0x38] sm:$0xf0] }
 0x2c6   : > { %v2204_v26 = vadd.f32 %v2203_v39, %v2175_v37  ;;  %v2232_v28 = vpop.f32.mrf.mxu2  ;;  %2405 = vmatmul.bf16.gmra.mxu0 %v1569_v62  ;;  %v3294_v62 = vor.u32 %v3416_v24, %v3293_v0  ;;  %v3407_v39 = vld [vmem:[%s4866_s7 + $0x34] sm:$0xf] }
 0x2c8   : > { %v2233_v31 = vadd.f32 %v2232_v28, %v2204_v26  ;;  %2538 = vmatpush.bf16.msra.mxu1 %v3294_v62  ;;  %v3406_v26 = vld [vmem:[%s4866_s7 + $0x24] sm:$0xf0] }
 0x2ca   : > { %v4612_v35 = vadd.f32 %v2261_v48, %v2233_v31  ;;  %v3253_v48 = vld [vmem:[%s4866_s7 + $0x20] sm:$0xf]  ;;  %v3405_v31 = vld [vmem:[%s4866_s7 + $0x24] sm:$0xf] }
 0x2cb   : > { %v4616_v10 = vpop.f32.mrf.mxu0  ;;  %v3254_v28 = vor.u32 %v3406_v26, %v3253_v48 }
 0x2ce   : > { %v4618_v38 = vpop.f32.mrf.mxu2 }
 0x2d3   : > { %v2179_v46 = vpop.f32.mrf.mxu0 }
 0x2d4   : > { %v2180_v40 = vadd.f32 %v4580_v58, %v2179_v46  ;;  %v3255_v46 = vld [vmem:[%s4866_s7 + $0x28] sm:$0xf0] }
 0x2d5   : > { %v3258_v0 = vor.u32 %v3405_v31, %v3255_v46 }
 0x2d6   : > { %v2209_v32 = vadd.f32 %v2208_v51, %v2180_v40  ;;  %v2237_v16 = vpop.f32.mrf.mxu2  ;;  %2410 = vmatmul.bf16.gmra.mxu0 %v1570_v36  ;;  %v3286_v36 = vor.u32 %v3414_v29, %v3285_v1  ;;  %v4711_v40 = vpop.f32.mrf.mxu1 }
 0x2d8   : > { %v2238_v56 = vadd.f32 %v2237_v16, %v2209_v32  ;;  %2539 = vmatpush.bf16.msra.mxu1 %v3286_v36  ;;  %v3245_v32 = vld [vmem:[%s4866_s7 + $0x10] sm:$0xf]  ;;  %v3404_v16 = vld [vmem:[%s4866_s7 + $0x14] sm:$0xf0]  ;;  %v2167_v36 = vadd.f32 %v4580_v58, %v4590_v54 }
 0x2d9   : > { %v3246_v30 = vor.u32 %v3404_v16, %v3245_v32 }
 0x2da   : > { %v4638_v5 = vadd.f32 %v2266_v52, %v2238_v56  ;;  %v3403_v56 = vld [vmem:[%s4866_s7 + $0x14] sm:$0xf]  ;;  %v2196_v63 = vadd.f32 %v4582_v59, %v2167_v36  ;;  %v2172_v59 = vadd.f32 %v4580_v58, %v4604_v8 }
 0x2db   : > { %v4640_v7 = vpop.f32.mrf.mxu0 }
 0x2dc   : > { %2540 = vmatpush.bf16.msra.mxu1 %v3278_v22  ;;  %v2367_v22 = vpop.f32.mrf.mxu3  ;;  %v2225_v19 = vadd.f32 %v4592_v47, %v2196_v63 }
 0x2de   : > { %v4713_v24 = vpop.f32.mrf.mxu2  ;;  %v2309_v4 = vpop.f32.mrf.mxu1 }
 0x2e0   : > { %2541 = vmatpush.bf16.msra.mxu1 %v3270_v61 }
 0x2e3   : > { %v2280_v53 = vpop.f32.mrf.mxu0 }
 0x2e4   : > { %v4654_v43 = vadd.f32 %v2280_v53, %v2252_v33  ;;  %v3409_v33 = vld [vmem:[%s4866_s7 + $0x44] sm:$0xf]  ;;  %2542 = vmatpush.bf16.msra.mxu1 %v3262_v18  ;;  %v3238_v53 = vor.u32 %v3402_v21, %v3237_v6 }
 0x2e5   : > { %v3274_v60 = vor.u32 %v3409_v33, %v3271_v9  ;;  %v2254_v33 = vadd.f32 %v4588_v34, %v2225_v19  ;;  %v2369_v9 = vpop.f32.mrf.mxu3 }
 0x2e6   : > { %v2338_v29 = vpop.f32.mrf.mxu2  ;;  %v2311_v13 = vpop.f32.mrf.mxu1 }
 0x2e7   : > { %2570 = vmatpush.bf16.msrb.mxu2 %v3274_v60  ;;  %v2310_v60 = vadd.f32 %v2309_v4, %v4654_v43 }
 0x2e8   : > { %2543 = vmatpush.bf16.msra.mxu1 %v3254_v28 }
 0x2e9   : > { %v2339_v2 = vadd.f32 %v2338_v29, %v2310_v60 }
 0x2eb   : > { %v4668_v14 = vpop.f32.mrf.mxu0 }
 0x2ec   : > { %2544 = vmatpush.bf16.msra.mxu1 %v3246_v30 }
 0x2ed   : > { %v2372_v48 = vpop.f32.mrf.mxu3 }
 0x2ee   : > { %v2340_v17 = vpop.f32.mrf.mxu2  ;;  %v2314_v23 = vpop.f32.mrf.mxu1 }
 0x2f0   : > { %2545 = vmatpush.bf16.msra.mxu1 %v3238_v53 }
 0x2f3   : > { %v2285_v49 = vpop.f32.mrf.mxu0 }
 0x2f4   : > { %v4683_v11 = vadd.f32 %v2285_v49, %v4600_v50  ;;  %v3266_v50 = vor.u32 %v3407_v39, %v3263_v25  ;;  %v2283_v49 = vadd.f32 %v4668_v14, %v2254_v33  ;;  %v2201_v25 = vadd.f32 %v4598_v15, %v2172_v59 }
 0x2f5   : > { %v2177_v15 = vadd.f32 %v4580_v58, %v4616_v10  ;;  %v2182_v33 = vadd.f32 %v4580_v58, %v4640_v7 }
 0x2f6   : > { %2571 = vmatpush.bf16.msrb.mxu2 %v3266_v50  ;;  %v2312_v18 = vadd.f32 %v2311_v13, %v2283_v49  ;;  %v2368_v50 = vadd.f32 %v2367_v22, %v2339_v2  ;;  %v2230_v34 = vadd.f32 %v4606_v42, %v2201_v25  ;;  %v2316_v28 = vpop.f32.mrf.mxu1  ;;  %v2374_v42 = vpop.f32.mrf.mxu3 }
 0x2f8   : > { %v2341_v47 = vadd.f32 %v2340_v17, %v2312_v18  ;;  %v2259_v46 = vadd.f32 %v4602_v55, %v2230_v34  ;;  %v2206_v55 = vadd.f32 %v4614_v12, %v2177_v15 }
 0x2fa   : > { %2572 = vmatpush.bf16.msrb.mxu2 %v3258_v0  ;;  %v2370_v43 = vadd.f32 %v2369_v9, %v2341_v47 }
 0x2fb   : > { %v4697_v37 = vpop.f32.mrf.mxu0 }
 0x2fc   : > { %v2288_v32 = vadd.f32 %v4697_v37, %v2259_v46  ;;  %v2235_v37 = vadd.f32 %v4618_v38, %v2206_v55 }
 0x2fe   : > { %v2319_v29 = vpop.f32.mrf.mxu1  ;;  %v2377_v10 = vpop.f32.mrf.mxu3 }
 0x303   : > { %v2290_v51 = vpop.f32.mrf.mxu0 }
 0x304   : > { %v4716_v62 = vadd.f32 %v2290_v51, %v4612_v35  ;;  %v3247_v35 = vld [vmem:[%s4866_s7 + $0x18] sm:$0xf0]  ;;  %v2315_v51 = vadd.f32 %v2314_v23, %v4683_v11 }
 0x305   : > { %v3250_v52 = vor.u32 %v3403_v56, %v3247_v35 }
 0x306   : > { %v2321_v63 = vpop.f32.mrf.mxu1  ;;  %v2320_v13 = vadd.f32 %v2319_v29, %v4716_v62  ;;  %v2452_v29 = vld [vmem:[%s4867_s8] sm:$0x3] }
 0x307   : > { %2573 = vmatpush.bf16.msrb.mxu2 %v3250_v52  ;;  %v2317_v52 = vadd.f32 %v2316_v28, %v2288_v32 }
 0x30b   : > { %v4732_v1 = vpop.f32.mrf.mxu0  ;;  %2574 = vmatpush.bf16.msrb.mxu2 %v3242_v45  ;;  %v2264_v45 = vadd.f32 %v4620_v57, %v2235_v37  ;;  %v2211_v57 = vadd.f32 %v4711_v40, %v2182_v33 }
 0x30d   : > { %v2293_v12 = vadd.f32 %v4732_v1, %v2264_v45  ;;  %v2240_v1 = vadd.f32 %v4713_v24, %v2211_v57 }
 0x30e   : > { %v2324_v18 = vpop.f32.mrf.mxu1 }
 0x30f   : > { %v2322_v49 = vadd.f32 %v2321_v63, %v2293_v12  ;;  %v2269_v7 = vadd.f32 %v4727_v20, %v2240_v1 }
 0x313   : > { %v2295_v54 = vpop.f32.mrf.mxu0 }
 0x314   : > { %v4750_v3 = vadd.f32 %v2295_v54, %v4638_v5  ;;  %v2343_v5 = vpop.f32.mrf.mxu2 }
 0x315   : > { %v2344_v35 = vadd.f32 %v2343_v5, %v2315_v51  ;;  %v2379_v5 = vpop.f32.mrf.mxu3 }
 0x316   : > { %v2325_v34 = vadd.f32 %v2324_v18, %v4750_v3 }
 0x317   : > { %v2373_v21 = vadd.f32 %v2372_v48, %v2344_v35 }
 0x31b   : > { %v4753_v61 = vpop.f32.mrf.mxu0 }
 0x31c   : > { %v2345_v31 = vpop.f32.mrf.mxu2  ;;  %v2298_v40 = vadd.f32 %v4753_v61, %v2269_v7 }
 0x31d   : > { %v2346_v11 = vadd.f32 %v2345_v31, %v2317_v52  ;;  %v2382_v28 = vpop.f32.mrf.mxu3 }
 0x31f   : > { %v2375_v53 = vadd.f32 %v2374_v42, %v2346_v11  ;;  %v4785_v11 = vperm.slane %v2452_v29, 1 }
 0x323   : > { %v2396_v39 = vpop.f32.mrf.mxu0 }
 0x324   : > { %v2397_v26 = vadd.f32 %v2396_v39, %v2368_v50  ;;  %v2348_v6 = vpop.f32.mrf.mxu2 }
 0x325   : > { %v2349_v60 = vadd.f32 %v2348_v6, %v2320_v13  ;;  %v2384_v15 = vpop.f32.mrf.mxu3 }
 0x326   : > { %v2416_v0 = vmax.f32 %v2397_v26, 0.0 }
 0x327   : > { %v2378_v62 = vadd.f32 %v2377_v10, %v2349_v60 }
 0x328   : > { %v2424_v56 = vmin.f32 %v2416_v0, 6.0 }
 0x32b   : > { %v2398_v14 = vpop.f32.mrf.mxu0 }
 0x32c   : > { %v2399_v8 = vadd.f32 %v2398_v14, %v2370_v43  ;;  %v2350_v19 = vpop.f32.mrf.mxu2  ;;  %v2326_v14 = vpop.f32.mrf.mxu1 }
 0x32d   : > { %v2351_v2 = vadd.f32 %v2350_v19, %v2322_v49  ;;  %v2327_v0 = vadd.f32 %v2326_v14, %v2298_v40 }
 0x32e   : > { %v2417_v16 = vmax.f32 %v2399_v8, 0.0 }
 0x32f   : > { %v2380_v47 = vadd.f32 %v2379_v5, %v2351_v2 }
 0x330   : > { %v2425_v30 = vmin.f32 %v2417_v16, 6.0 }
 0x332   : > { %v2432_v4 = vpack.c.bf16 %v2425_v30, %v2424_v56 }
 0x333   : > { %v2401_v36 = vpop.f32.mrf.mxu0 }
 0x334   : > { %2546 = vmatmul.bf16.vlgmr.msra.gmra.mxu1 %v2432_v4  ;;  %2575 = vmatmul.bf16.vlgmr.msrb.gmra.mxu2 %v2432_v4  ;;  %v2402_v41 = vadd.f32 %v2401_v36, %v2373_v21  ;;  %v2353_v25 = vpop.f32.mrf.mxu2  ;;  %v4782_v36 = vperm.slane %v2452_v29, 0 }
 0x335   : > { %v2354_v46 = vadd.f32 %v2353_v25, %v2325_v34 }
 0x336   : > { %v2418_v22 = vmax.f32 %v2402_v41, 0.0 }
 0x337   : > { %v2383_v20 = vadd.f32 %v2382_v28, %v2354_v46 }
 0x338   : > { %v2426_v9 = vmin.f32 %v2418_v22, 6.0 }
 0x33b   : > { %v2403_v44 = vpop.f32.mrf.mxu0 }
 0x33c   : > { %v2404_v54 = vadd.f32 %v2403_v44, %v2375_v53  ;;  %v2355_v8 = vpop.f32.mrf.mxu2 }
 0x33d   : > { %v2356_v32 = vadd.f32 %v2355_v8, %v2327_v0 }
 0x33e   : > { %v2419_v17 = vmax.f32 %v2404_v54, 0.0 }
 0x33f   : > { %v2385_v56 = vadd.f32 %v2384_v15, %v2356_v32 }
 0x340   : > { %v2427_v38 = vmin.f32 %v2419_v17, 6.0 }
 0x342   : > { %v2433_v23 = vpack.c.bf16 %v2427_v38, %v2426_v9 }
 0x343   : > { %v2406_v59 = vpop.f32.mrf.mxu0 }
 0x344   : > { %2551 = vmatmul.bf16.gmra.mxu1 %v2433_v23  ;;  %2580 = vmatmul.bf16.gmra.mxu2 %v2433_v23  ;;  %v2407_v39 = vadd.f32 %v2406_v59, %v2378_v62 }
 0x346   : > { %v2420_v50 = vmax.f32 %v2407_v39, 0.0 }
 0x348   : > { %v2428_v43 = vmin.f32 %v2420_v50, 6.0 }
 0x34b   : > { %v2408_v58 = vpop.f32.mrf.mxu0 }
 0x34c   : > { %v2409_v48 = vadd.f32 %v2408_v58, %v2380_v47 }
 0x34e   : > { %v2421_v26 = vmax.f32 %v2409_v48, 0.0 }
 0x350   : > { %v2429_v31 = vmin.f32 %v2421_v26, 6.0 }
 0x352   : > { %v2434_v24 = vpack.c.bf16 %v2429_v31, %v2428_v43 }
 0x353   : > { %v2411_v51 = vpop.f32.mrf.mxu0 }
 0x354   : > { %2556 = vmatmul.bf16.gmra.mxu1 %v2434_v24  ;;  %2585 = vmatmul.bf16.gmra.mxu2 %v2434_v24  ;;  %v2412_v16 = vadd.f32 %v2411_v51, %v2383_v20 }
 0x356   : > { %v2422_v30 = vmax.f32 %v2412_v16, 0.0 }
 0x358   : > { %v2430_v35 = vmin.f32 %v2422_v30, 6.0 }
 0x35b   : > { %v2413_v3 = vpop.f32.mrf.mxu0 }
 0x35c   : > { %v2414_v61 = vadd.f32 %v2413_v3, %v2385_v56 }
 0x35e   : > { %v2423_v42 = vmax.f32 %v2414_v61, 0.0 }
 0x360   : > { %v2431_v52 = vmin.f32 %v2423_v42, 6.0 }
 0x362   : > { %v2435_v4 = vpack.c.bf16 %v2431_v52, %v2430_v35 }
 0x364   : > { %2561 = vmatmul.bf16.gmra.mxu1 %v2435_v4  ;;  %2590 = vmatmul.bf16.gmra.mxu2 %v2435_v4 }
 0x3b1   : > { %v2547_v55 = vpop.f32.mrf.mxu1 }
 0x3b2   : > { %v2548_v6 = vadd.f32 %v2547_v55, %v4782_v36 }
 0x3b4   : > { %v2596_v37 = vmax.f32 %v2548_v6, 0.0 }
 0x3b6   : > { %v2612_v44 = vmin.f32 %v2596_v37, 6.0 }
 0x3b7   : > { %v2576_v21 = vpop.f32.mrf.mxu2 }
 0x3b8   : > { %v2577_v53 = vadd.f32 %v2576_v21, %v4785_v11  ;;  %v2628_v13 = vmul.f32 2.0, %v2612_v44 }
 0x3b9   : > { %v2549_v41 = vpop.f32.mrf.mxu1 }
 0x3ba   : > { %v2550_v10 = vadd.f32 %v2549_v41, %v4782_v36  ;;  %v2597_v22 = vmax.f32 %v2577_v53, 0.0 }
 0x3bc   : > { %v2598_v45 = vmax.f32 %v2550_v10, 0.0  ;;  %v2613_v33 = vmin.f32 %v2597_v22, 6.0 }
 0x3be   : > { %v2614_v54 = vmin.f32 %v2598_v45, 6.0  ;;  %v2629_v23 = vmul.f32 2.0, %v2613_v33 }
 0x3bf   : > { %v2578_v63 = vpop.f32.mrf.mxu2 }
 0x3c0   : > { %v2630_v12 = vmul.f32 2.0, %v2614_v54  ;;  %v2579_v17 = vadd.f32 %v2578_v63, %v4785_v11 }
 0x3c1   : > { %v2552_v19 = vpop.f32.mrf.mxu1 }
 0x3c2   : > { %v2644_v9 = vpack.c.bf16 %v2630_v12, %v2628_v13  ;;  %v2599_v38 = vmax.f32 %v2579_v17, 0.0  ;;  %v2553_v49 = vadd.f32 %v2552_v19, %v4782_v36 }
 0x3c4   : > { %v2615_v60 = vmin.f32 %v2599_v38, 6.0  ;;  %2660 = vmatmul.bf16.vlgmr.msrb.gmra.mxu3 %v2644_v9  ;;  %v2600_v2 = vmax.f32 %v2553_v49, 0.0 }
 0x3c6   : > { %v2631_v59 = vmul.f32 2.0, %v2615_v60  ;;  %v2616_v39 = vmin.f32 %v2600_v2, 6.0 }
 0x3c7   : > { %v2581_v57 = vpop.f32.mrf.mxu2 }
 0x3c8   : > { %v2645_v5 = vpack.c.bf16 %v2631_v59, %v2629_v23  ;;  %v2582_v18 = vadd.f32 %v2581_v57, %v4785_v11  ;;  %v2632_v50 = vmul.f32 2.0, %v2616_v39 }
 0x3c9   : > { %v2554_v62 = vpop.f32.mrf.mxu1 }
 0x3ca   : > { %v2555_v1 = vadd.f32 %v2554_v62, %v4782_v36  ;;  %2689 = vmatmul.bf16.vlgmr.msra.gmra.mxu0 %v2645_v5  ;;  %v2601_v47 = vmax.f32 %v2582_v18, 0.0 }
 0x3cc   : > { %v2602_v25 = vmax.f32 %v2555_v1, 0.0  ;;  %v2617_v26 = vmin.f32 %v2601_v47, 6.0 }
 0x3ce   : > { %v2618_v58 = vmin.f32 %v2602_v25, 6.0  ;;  %v2633_v46 = vmul.f32 2.0, %v2617_v26 }
 0x3cf   : > { %v2583_v7 = vpop.f32.mrf.mxu2 }
 0x3d0   : > { %v2634_v48 = vmul.f32 2.0, %v2618_v58  ;;  %v2584_v34 = vadd.f32 %v2583_v7, %v4785_v11 }
 0x3d1   : > { %v2557_v40 = vpop.f32.mrf.mxu1 }
 0x3d2   : > { %v2603_v28 = vmax.f32 %v2584_v34, 0.0  ;;  %v2646_v43 = vpack.c.bf16 %v2634_v48, %v2632_v50  ;;  %v2558_v14 = vadd.f32 %v2557_v40, %v4782_v36 }
 0x3d4   : > { %v2619_v31 = vmin.f32 %v2603_v28, 6.0  ;;  %2665 = vmatmul.bf16.gmra.mxu3 %v2646_v43  ;;  %v2604_v8 = vmax.f32 %v2558_v14, 0.0 }
 0x3d6   : > { %v2635_v0 = vmul.f32 2.0, %v2619_v31  ;;  %v2620_v15 = vmin.f32 %v2604_v8, 6.0 }
 0x3d7   : > { %v2586_v24 = vpop.f32.mrf.mxu2 }
 0x3d8   : > { %v2647_v51 = vpack.c.bf16 %v2635_v0, %v2633_v46  ;;  %v2587_v20 = vadd.f32 %v2586_v24, %v4785_v11  ;;  %v2636_v42 = vmul.f32 2.0, %v2620_v15 }
 0x3d9   : > { %v2559_v32 = vpop.f32.mrf.mxu1 }
 0x3da   : > { %v2560_v16 = vadd.f32 %v2559_v32, %v4782_v36  ;;  %2694 = vmatmul.bf16.gmra.mxu0 %v2647_v51  ;;  %v2605_v3 = vmax.f32 %v2587_v20, 0.0 }
 0x3dc   : > { %v2606_v56 = vmax.f32 %v2560_v16, 0.0  ;;  %v2621_v29 = vmin.f32 %v2605_v3, 6.0 }
 0x3de   : > { %v2622_v30 = vmin.f32 %v2606_v56, 6.0  ;;  %v2637_v41 = vmul.f32 2.0, %v2621_v29 }
 0x3df   : > { %v2588_v61 = vpop.f32.mrf.mxu2 }
 0x3e0   : > { %v2638_v35 = vmul.f32 2.0, %v2622_v30  ;;  %v2589_v52 = vadd.f32 %v2588_v61, %v4785_v11 }
 0x3e1   : > { %v2562_v4 = vpop.f32.mrf.mxu1 }
 0x3e2   : > { %v2607_v55 = vmax.f32 %v2589_v52, 0.0  ;;  %v2648_v6 = vpack.c.bf16 %v2638_v35, %v2636_v42  ;;  %v2563_v37 = vadd.f32 %v2562_v4, %v4782_v36 }
 0x3e4   : > { %v2623_v21 = vmin.f32 %v2607_v55, 6.0  ;;  %2670 = vmatmul.bf16.gmra.mxu3 %v2648_v6  ;;  %v2608_v44 = vmax.f32 %v2563_v37, 0.0 }
 0x3e6   : > { %v2639_v53 = vmul.f32 2.0, %v2623_v21  ;;  %v2624_v13 = vmin.f32 %v2608_v44, 6.0  ;;  %v3562_v44 = vld [vmem:[%s4863_s4] ss:$0 sm:$0xff] }
 0x3e7   : > { %v2591_v10 = vpop.f32.mrf.mxu2 }
 0x3e8   : > { %v2649_v45 = vpack.c.bf16 %v2639_v53, %v2637_v41  ;;  %v2592_v54 = vadd.f32 %v2591_v10, %v4785_v11  ;;  %v2640_v9 = vmul.f32 2.0, %v2624_v13 }
 0x3e9   : > { %v2564_v22 = vpop.f32.mrf.mxu1 }
 0x3ea   : > { %v2565_v63 = vadd.f32 %v2564_v22, %v4782_v36  ;;  %2699 = vmatmul.bf16.gmra.mxu0 %v2649_v45  ;;  %v2609_v17 = vmax.f32 %v2592_v54, 0.0 }
 0x3ec   : > { %v2610_v12 = vmax.f32 %v2565_v63, 0.0  ;;  %v2625_v49 = vmin.f32 %v2609_v17, 6.0 }
 0x3ee   : > { %v2626_v19 = vmin.f32 %v2610_v12, 6.0  ;;  %v2641_v5 = vmul.f32 2.0, %v2625_v49 }
 0x3ef   : > { %v2593_v33 = vpop.f32.mrf.mxu2 }
 0x3f0   : > { %v2642_v38 = vmul.f32 2.0, %v2626_v19  ;;  %v2594_v60 = vadd.f32 %v2593_v33, %v4785_v11 }
 0x3f2   : > { %v2611_v23 = vmax.f32 %v2594_v60, 0.0  ;;  %v2650_v59 = vpack.c.bf16 %v2642_v38, %v2640_v9 }
 0x3f4   : > { %v2627_v57 = vmin.f32 %v2611_v23, 6.0  ;;  %2675 = vmatmul.bf16.gmra.mxu3 %v2650_v59 }
 0x3f6   : > { %v2643_v2 = vmul.f32 2.0, %v2627_v57 }
 0x3f8   : > { %v2651_v36 = vpack.c.bf16 %v2643_v2, %v2641_v5 }
 0x3fa   : > { %2704 = vmatmul.bf16.gmra.mxu0 %v2651_v36 }
 0x447   : > { %v2661_v62 = vpop.f32.mrf.mxu3  ;;  %v2690_v18 = vpop.f32.mrf.mxu0 }
 0x448   : > { %v2662_v1 = vadd.f32 %v4454_v27, %v2661_v62 }
 0x44a   : > { %v2691_v39 = vadd.f32 %v2690_v18, %v2662_v1 }
 0x44c   : > { %v2710_v25 = vmax.f32 %v2691_v39, 0.0 }
 0x44e   : > { %v2718_v47 = vmin.f32 %v2710_v25, 6.0 }
 0x44f   : > { %v2663_v11 = vpop.f32.mrf.mxu3  ;;  %v2692_v58 = vpop.f32.mrf.mxu0 }
 0x450   : > { %2726 = vst [vmem:[%s4806_s22] sm:$0xff] %v2718_v47  ;;  %v2664_v7 = vadd.f32 %v4454_v27, %v2663_v11 }
 0x452   : > { %v2693_v50 = vadd.f32 %v2692_v58, %v2664_v7 }
 0x454   : > { %v2711_v48 = vmax.f32 %v2693_v50, 0.0 }
 0x456   : > { %v2719_v34 = vmin.f32 %v2711_v48, 6.0 }
 0x457   : > { %v2666_v40 = vpop.f32.mrf.mxu3  ;;  %v2695_v26 = vpop.f32.mrf.mxu0 }
 0x458   : > { %2727 = vst [vmem:[%s4806_s22 + $0x8] sm:$0xff] %v2719_v34  ;;  %v2667_v28 = vadd.f32 %v4454_v27, %v2666_v40 }
 0x45a   : > { %v2696_v43 = vadd.f32 %v2695_v26, %v2667_v28 }
 0x45c   : > { %v2712_v31 = vmax.f32 %v2696_v43, 0.0 }
 0x45e   : > { %v2720_v14 = vmin.f32 %v2712_v31, 6.0 }
 0x45f   : > { %v2668_v46 = vpop.f32.mrf.mxu3  ;;  %v2697_v0 = vpop.f32.mrf.mxu0 }
 0x460   : > { %2728 = vst [vmem:[%s4806_s22 + $0x10] sm:$0xff] %v2720_v14  ;;  %v2669_v24 = vadd.f32 %v4454_v27, %v2668_v46 }
 0x462   : > { %v2698_v8 = vadd.f32 %v2697_v0, %v2669_v24 }
 0x464   : > { %v2713_v51 = vmax.f32 %v2698_v8, 0.0 }
 0x466   : > { %v2721_v32 = vmin.f32 %v2713_v51, 6.0 }
 0x467   : > { %v2671_v20 = vpop.f32.mrf.mxu3  ;;  %v2700_v16 = vpop.f32.mrf.mxu0 }
 0x468   : > { %2729 = vst [vmem:[%s4806_s22 + $0x18] sm:$0xff] %v2721_v32  ;;  %v2672_v15 = vadd.f32 %v4454_v27, %v2671_v20 }
 0x46a   : > { %v2701_v56 = vadd.f32 %v2700_v16, %v2672_v15 }
 0x46c   : > { %v2714_v3 = vmax.f32 %v2701_v56, 0.0 }
 0x46e   : > { %v2722_v30 = vmin.f32 %v2714_v3, 6.0 }
 0x46f   : > { %v2673_v61 = vpop.f32.mrf.mxu3  ;;  %v2702_v42 = vpop.f32.mrf.mxu0 }
 0x470   : > { %2730 = vst [vmem:[%s4806_s22 + $0x20] sm:$0xff] %v2722_v30  ;;  %v2674_v35 = vadd.f32 %v4454_v27, %v2673_v61 }
 0x472   : > { %v2703_v52 = vadd.f32 %v2702_v42, %v2674_v35 }
 0x474   : > { %v2715_v4 = vmax.f32 %v2703_v52, 0.0 }
 0x476   : > { %v2723_v29 = vmin.f32 %v2715_v4, 6.0 }
 0x477   : > { %v2676_v55 = vpop.f32.mrf.mxu3  ;;  %v2705_v6 = vpop.f32.mrf.mxu0 }
 0x478   : > { %2731 = vst [vmem:[%s4806_s22 + $0x28] sm:$0xff] %v2723_v29  ;;  %v2677_v21 = vadd.f32 %v4454_v27, %v2676_v55 }
 0x47a   : > { %v2706_v37 = vadd.f32 %v2705_v6, %v2677_v21 }
 0x47c   : > { %v2716_v41 = vmax.f32 %v2706_v37, 0.0 }
 0x47e   : > { %v2724_v53 = vmin.f32 %v2716_v41, 6.0 }
 0x47f   : > { %v2678_v10 = vpop.f32.mrf.mxu3  ;;  %v2707_v22 = vpop.f32.mrf.mxu0 }
 0x480   : > { %2732 = vst [vmem:[%s4806_s22 + $0x30] sm:$0xff] %v2724_v53  ;;  %v2679_v45 = vadd.f32 %v3562_v44, %v2678_v10 }
 0x482   : > { %v2708_v27 = vadd.f32 %v2707_v22, %v2679_v45 }
 0x484   : > { %v2717_v54 = vmax.f32 %v2708_v27, 0.0 }
 0x486   : > { %v2725_v63 = vmin.f32 %v2717_v54, 6.0 }
 0x488   : > { %2733 = vst [vmem:[%s4806_s22 + $0x38] sm:$0xff] %v2725_v63 }
 0x489   : > { %3590 = shalt.err (!%p3587_p3)
}
 0x48a   : > { %s3628_s17 = smov 128   ;;  %s3629_s22 = smov 8  }
 0x48b   : > { %3501 = dma.vmem_to_hbm [thread:$0]  (%p3718_p5), %s2748_s28, 1024, %s2750_s14, %s2735_s13, %s3628_s17, %s3628_s17, %s3629_s22  }
 0x48c PF: > { %p3507_p4 = scmp.ge.s32.totalorder %s3625_s12, 2  ;;  %s2764_s27 = sand.u32 1, %s3613_s30  }
 0x48d   : > { %s2765_s23 = scalar_lea.sflag [#allocation3], %s2764_s27 }
 0x48e   : > { %p3504_p7 = pnand %p3507_p4, %p3722_p6 }
 0x490   : > { %p3505_p8 = pneg %p3504_p7 }
 0x492   : > { %3608 = dma.done.wait (%p3505_p8), %s2765_s23, 1024  }
 0x493   : > { %3610 = vsyncadd (%p3505_p8), %s2765_s23, 4294966272  ;;  %p19_p9 = scmp.ge.s32.totalorder %s3705_s15, 4   ;;  %s4871_s30 = smov %s3617_s10 }
 0x494   : > { %s4872_s10 = smov %s3621_s11  ;;  %s4873_s11 = smov %s3716_s18 }
 0x495   : > { %s4874_s12 = smov %s3705_s15  ;;  %21 = sbr.rel (!%p19_p9) target bundleno = 3 (0x3), region = 91 }
 0x49a   :  { %2771 = vsyncpa [#allocation3], 1 }
 0x49b   :  { %2773 = vsyncpa [#allocation3 + $0x1], 1 }

</bundles_post_ra>
